<compile_context>
chip_gen: v5e
topology: v5e:2x2
jax: 0.10.0
libtpu: 0.0.40
codegen_flags: <defaults>
</compile_context>

<pallas_src>
import math
import functools

import jax
import jax.numpy as jnp
from jax import lax
from jax.experimental import pallas as pl
from jax.experimental.pallas import tpu as pltpu

LN_EPS = 1e-5                  # PyTorch nn.LayerNorm default eps
NEG_BIG = -1e30                # finite "minus infinity" for masking (no exp(-inf - -inf) NaN)
LM_TV = 256                    # lm_head vocab tile (>=256 to fill v6e/v7x 256-wide MXU)
VMEM_LIMIT = 48 * 1024 * 1024  # explicit scoped-VMEM limit; fits v5e/v6e/v7x


def _layernorm(x, w, b=None, eps=LN_EPS):
    mu = jnp.mean(x, axis=-1, keepdims=True)
    xc = x - mu
    var = jnp.mean(xc * xc, axis=-1, keepdims=True)
    y = xc * lax.rsqrt(var + eps) * w
    if b is not None:
        y = y + b
    return y


def _const_spec(shape):
    """BlockSpec for an operand whose block index never changes across the grid.

    Single-buffered (pl.Buffered(1)) so constant weights are not double-buffered in VMEM;
    falls back to a default spec if this JAX version does not accept pipeline_mode.
    """
    index_map = lambda *_idx, _n=len(shape): (0,) * _n
    try:
        return pl.BlockSpec(shape, index_map, pipeline_mode=pl.Buffered(1))
    except Exception:
        return pl.BlockSpec(shape, index_map)


# ------------------------------------------------------------------ transformer block
def transformer_block_kernel(x_ref, ln1w_ref, ln1b_ref, wqkv_ref, wo_ref,
                             ln2w_ref, ln2b_ref, w1_ref, b1_ref, w2_ref, b2_ref,
                             o_ref, *, num_heads, head_dim):
    x = x_ref[0].astype(jnp.float32)                        # (L, D); residual stream is bf16 in HBM
    L, D = x.shape
    H, Dh = num_heads, head_dim

    # ---- LayerNorm 1 + fused QKV projection: one (L,D)x(D,3D) bf16 MXU matmul ----
    xn = _layernorm(x, ln1w_ref[...], ln1b_ref[...])
    qkv = jnp.dot(xn.astype(jnp.bfloat16), wqkv_ref[...],
                  preferred_element_type=jnp.float32)       # (L, 3D), f32 accumulate
    qkv = qkv.astype(jnp.bfloat16)

    # ---- batched-heads causal attention (qkv_bias=False, dropout=0) ----
    def to_heads(t):                                        # (L, D) -> (H, L, Dh)
        return jnp.stack([t[:, h * Dh:(h + 1) * Dh] for h in range(H)], axis=0)

    qh = to_heads(qkv[:, :D])
    kh = to_heads(qkv[:, D:2 * D])
    vh = to_heads(qkv[:, 2 * D:])

    scale = 1.0 / math.sqrt(Dh)
    s = jnp.einsum('hqd,hkd->hqk', qh, kh,
                   preferred_element_type=jnp.float32) * scale        # (H, L, L)
    row = lax.broadcasted_iota(jnp.int32, (L, L), 0)
    col = lax.broadcasted_iota(jnp.int32, (L, L), 1)
    s = jnp.where((row >= col)[None, :, :], s, NEG_BIG)
    m = jnp.max(s, axis=-1, keepdims=True)
    p = jnp.exp(s - m)
    p = p * pl.reciprocal(jnp.sum(p, axis=-1, keepdims=True), approx=True)
    # TODO(synk): switch to a flash-style (tq x tk) tiled loop once L grows past a few
    # hundred; the (H, L, L) score tensor is the VMEM limiter at long sequence lengths.
    o = jnp.einsum('hqk,hkd->hqd', p.astype(jnp.bfloat16), vh,
                   preferred_element_type=jnp.float32)                # (H, L, Dh)

    attn = jnp.concatenate([o[h] for h in range(H)], axis=-1)         # (L, D), concat heads
    attn_out = jnp.dot(attn.astype(jnp.bfloat16), wo_ref[...],
                       preferred_element_type=jnp.float32)            # fused output projection
    store = attn_out + x                                              # residual 1

    # ---- LayerNorm 2 + MLP (bf16 operands, f32 accumulate) ----
    sn = _layernorm(store, ln2w_ref[...], ln2b_ref[...])
    h1 = jnp.dot(sn.astype(jnp.bfloat16), w1_ref[...],
                 preferred_element_type=jnp.float32) + b1_ref[...]
    # TODO(synk): PyTorch nn.GELU() default is the exact erf form; tanh approximation used.
    h1 = jax.nn.gelu(h1, approximate=True)
    h2 = jnp.dot(h1.astype(jnp.bfloat16), w2_ref[...],
                 preferred_element_type=jnp.float32) + b2_ref[...]
    o_ref[0] = (h2 + store).astype(o_ref.dtype)                       # residual 2 (bf16 out)


def apply_block(x, bp, num_heads):
    B, L, D = x.shape
    Dh = D // num_heads
    mlp_dim = bp["w1"].shape[1]
    # TODO(synk): for B == 1 on v7x add a second parallel axis (query-row tiles) so both
    # TensorCores get work; K/N-tile the MLP once D*mlp_dim no longer fits comfortably.
    kernel = functools.partial(transformer_block_kernel,
                               num_heads=num_heads, head_dim=Dh)
    return pl.pallas_call(
        kernel,
        out_shape=jax.ShapeDtypeStruct((B, L, D), x.dtype),
        grid=(B,),
        in_specs=[
            pl.BlockSpec((1, L, D), lambda b: (b, 0, 0)),
            _const_spec((1, D)), _const_spec((1, D)),        # ln1 w/b
            _const_spec((D, 3 * D)),                         # fused wqkv (bf16)
            _const_spec((D, D)),                             # fused wo   (bf16)
            _const_spec((1, D)), _const_spec((1, D)),        # ln2 w/b
            _const_spec((D, mlp_dim)), _const_spec((1, mlp_dim)),
            _const_spec((mlp_dim, D)), _const_spec((1, D)),
        ],
        out_specs=pl.BlockSpec((1, L, D), lambda b: (b, 0, 0)),
        compiler_params=pltpu.CompilerParams(
            dimension_semantics=("parallel",),
            vmem_limit_bytes=VMEM_LIMIT),
    )(x, bp["ln1w"], bp["ln1b"], bp["wqkv"], bp["wo"],
      bp["ln2w"], bp["ln2b"], bp["w1"], bp["b1"], bp["w2"], bp["b2"])


# ------------------------------------------------------------------ final LN + lm_head + CE
# Grid = (NV,): the vocab-padded (D, Vp) weight streams through VMEM exactly once for the
# whole flattened batch; running max / sum-exp / picked-logit accumulate in VMEM scratch
# (online logsumexp over vocab tiles).  Padded vocab columns are masked out of the LSE.
def lm_head_kernel(x_ref, lnw_ref, wlm_ref, tgt_ref, logits_ref, loss_ref,
                   xn_sc, m_sc, l_sc, pick_sc, *, vocab_size):
    vi = pl.program_id(0)
    nv = pl.num_programs(0)

    @pl.when(vi == 0)
    def _init():
        x = x_ref[...].astype(jnp.float32)                   # (N, D)
        xn_sc[...] = _layernorm(x, lnw_ref[...], None).astype(jnp.bfloat16)  # final LN, no bias
        m_sc[...] = jnp.full(m_sc.shape, NEG_BIG, jnp.float32)
        l_sc[...] = jnp.zeros(l_sc.shape, jnp.float32)
        pick_sc[...] = jnp.zeros(pick_sc.shape, jnp.float32)

    # (N, D) x (D, TV) bf16 matmul for this vocab tile.
    logits = jnp.dot(xn_sc[...], wlm_ref[...], preferred_element_type=jnp.float32)
    # bf16 writeback halves the dominant HBM write of the forward pass.
    # TODO(synk): add a loss-only variant that skips this logits store entirely.
    logits_ref[...] = logits.astype(logits_ref.dtype)

    N, TV = logits.shape
    vid = vi * TV + lax.broadcasted_iota(jnp.int32, (N, TV), 1)   # global vocab ids
    masked = jnp.where(vid < vocab_size, logits, NEG_BIG)          # hide vocab padding
    tgt = tgt_ref[...]                                             # (N, 1) int32
    pick_sc[...] += jnp.sum(jnp.where(vid == tgt, logits, 0.0), axis=-1, keepdims=True)

    m_prev = m_sc[...]
    m_new = jnp.maximum(m_prev, jnp.max(masked, axis=-1, keepdims=True))
    l_sc[...] = (l_sc[...] * jnp.exp(m_prev - m_new)
                 + jnp.sum(jnp.exp(masked - m_new), axis=-1, keepdims=True))
    m_sc[...] = m_new

    @pl.when(vi == nv - 1)
    def _finalize():
        # per-token cross entropy = logsumexp(logits) - logit[target]
        loss_ref[...] = (m_sc[...] + jnp.log(l_sc[...]) - pick_sc[...]).astype(loss_ref.dtype)


def apply_lm_head(x, lnw, wlm_padded, targets, vocab_size):
    B, L, D = x.shape
    N = B * L
    Vp = wlm_padded.shape[1]
    NV = Vp // LM_TV
    x2d = x.reshape(N, D)
    tgt = targets.astype(jnp.int32).reshape(N, 1)

    kernel = functools.partial(lm_head_kernel, vocab_size=vocab_size)
    logits_pad, per_tok_loss = pl.pallas_call(
        kernel,
        out_shape=(jax.ShapeDtypeStruct((N, Vp), jnp.bfloat16),
                   jax.ShapeDtypeStruct((N, 1), jnp.float32)),
        grid=(NV,),
        in_specs=[
            _const_spec((N, D)),                              # activations resident across tiles
            _const_spec((1, D)),                              # final LN weight
            pl.BlockSpec((D, LM_TV), lambda v: (0, v)),       # vocab-tiled weight (bf16), streamed once
            _const_spec((N, 1)),                              # targets
        ],
        out_specs=(pl.BlockSpec((N, LM_TV), lambda v: (0, v)),
                   pl.BlockSpec((N, 1), lambda v: (0, 0))),
        scratch_shapes=[pltpu.VMEM((N, D), jnp.bfloat16),     # cached normalized x
                        pltpu.VMEM((N, 1), jnp.float32),      # running max
                        pltpu.VMEM((N, 1), jnp.float32),      # running sum-exp
                        pltpu.VMEM((N, 1), jnp.float32)],     # picked target logit
        compiler_params=pltpu.CompilerParams(
            dimension_semantics=("arbitrary",),
            vmem_limit_bytes=VMEM_LIMIT),
    )(x2d, lnw, wlm_padded, tgt)

    logits = logits_pad[:, :vocab_size].astype(jnp.float32).reshape(B, L, vocab_size)
    return logits, per_tok_loss.reshape(B, L)


# ------------------------------------------------------------------ parameters
def init_params(key, vocab_size, max_seqlen, embed_dim, num_heads, blocklayers,
                mlp_ratio=4.0):
    D = embed_dim
    mlp_dim = int(D * mlp_ratio)
    keys = jax.random.split(key, 2 + blocklayers)

    tok_emb = 0.02 * jax.random.normal(keys[0], (vocab_size, D), jnp.float32)
    pos_emb = 0.02 * jax.random.normal(keys[1], (max_seqlen, D), jnp.float32)

    blocks = []
    for li in range(blocklayers):
        bk = jax.random.split(keys[2 + li], 6)
        wqkv_pt = 0.02 * jax.random.normal(bk[0], (3 * D, D), jnp.float32)  # PyTorch (out,in)
        wout_pt = 0.02 * jax.random.normal(bk[1], (D, D), jnp.float32)
        w1_pt = 0.02 * jax.random.normal(bk[2], (mlp_dim, D), jnp.float32)
        w2_pt = 0.02 * jax.random.normal(bk[3], (D, mlp_dim), jnp.float32)
        b1 = 0.02 * jax.random.normal(bk[4], (1, mlp_dim), jnp.float32)
        b2 = 0.02 * jax.random.normal(bk[5], (1, D), jnp.float32)

        blocks.append(dict(
            ln1w=jnp.ones((1, D), jnp.float32), ln1b=jnp.zeros((1, D), jnp.float32),
            wqkv=wqkv_pt.T.astype(jnp.bfloat16),        # (D, 3D): [q | k | v] columns
            wo=wout_pt.T.astype(jnp.bfloat16),          # (D, D)
            ln2w=jnp.ones((1, D), jnp.float32), ln2b=jnp.zeros((1, D), jnp.float32),
            w1=w1_pt.T.astype(jnp.bfloat16), b1=b1,
            w2=w2_pt.T.astype(jnp.bfloat16), b2=b2,
        ))

    # Vocab-pad the tied lm_head weight once at init (kept out of the per-step path).
    Vp = ((vocab_size + LM_TV - 1) // LM_TV) * LM_TV
    lm_head_t = jnp.zeros((D, Vp), jnp.float32).at[:, :vocab_size].set(tok_emb.T)
    # TODO(synk): lm_head_t is a materialized bf16 copy of tok_emb; the weight tie is not
    # maintained under training updates.
    params = dict(
        tok_emb=tok_emb,                          # (V, D) f32, used for the embedding gather
        pos_emb=pos_emb,
        blocks=blocks,
        final_lnw=jnp.ones((1, D), jnp.float32),
        lm_head_t=lm_head_t.astype(jnp.bfloat16),  # (D, Vp) tied + vocab-padded lm_head weight
    )
    return params


# ------------------------------------------------------------------ full forward
def toygpt_forward(params, input_ids, targets=None, masks=None, *, num_heads, vocab_size):
    B, L = input_ids.shape
    # embedding lookup + position embedding (glue; gather is not the hot path);
    # residual stream carried in bf16 between blocks.
    x = (params["tok_emb"][input_ids] + params["pos_emb"][:L]).astype(jnp.bfloat16)

    for bp in params["blocks"]:
        x = apply_block(x, bp, num_heads)

    tgt = targets if targets is not None else jnp.zeros((B, L), jnp.int32)
    logits, per_tok_loss = apply_lm_head(x, params["final_lnw"], params["lm_head_t"],
                                         tgt, vocab_size)

    if targets is not None:
        flat_loss = per_tok_loss.reshape(-1)
        if masks is not None:
            m = masks.reshape(-1).astype(jnp.float32)
            loss = jnp.sum(flat_loss * m) / jnp.sum(m)
        else:
            loss = jnp.mean(flat_loss)
        return logits, loss
    else:
        return logits[:, -1:, :], None


# ------------------------------------------------------------------ pure-JAX reference
def toygpt_reference(params, input_ids, targets, num_heads, vocab_size):
    B, L = input_ids.shape
    D = params["tok_emb"].shape[1]
    H, Dh = num_heads, D // num_heads
    x = (params["tok_emb"][input_ids] + params["pos_emb"][:L]).astype(jnp.float32)
    for bp in params["blocks"]:
        xn = _layernorm(x, bp["ln1w"], bp["ln1b"])
        qkv = xn @ bp["wqkv"].astype(jnp.float32)
        q, k, v = jnp.split(qkv, 3, axis=-1)
        heads = lambda t: t.reshape(B, L, H, Dh).transpose(0, 2, 1, 3)
        q, k, v = heads(q), heads(k), heads(v)
        s = (q @ jnp.swapaxes(k, -1, -2)) / math.sqrt(Dh)
        causal = jnp.tril(jnp.ones((L, L), bool))
        s = jnp.where(causal, s, NEG_BIG)
        p = jax.nn.softmax(s, axis=-1)
        attn = (p @ v).transpose(0, 2, 1, 3).reshape(B, L, D)
        store = attn @ bp["wo"].astype(jnp.float32) + x
        sn = _layernorm(store, bp["ln2w"], bp["ln2b"])
        h1 = jax.nn.gelu(sn @ bp["w1"].astype(jnp.float32) + bp["b1"], approximate=True)
        x = h1 @ bp["w2"].astype(jnp.float32) + bp["b2"] + store
    xn = _layernorm(x, params["final_lnw"], None)
    w = params["lm_head_t"].astype(jnp.float32)[:, :vocab_size]
    logits = xn @ w
    logp = jax.nn.log_softmax(logits, axis=-1)
    ce = -jnp.take_along_axis(logp, targets[..., None], axis=-1)[..., 0]
    return logits, jnp.mean(ce)


if __name__ == "__main__":
    # TODO(synk): tokenizer loading and the autoregressive generate() loop (torch.multinomial)
    # are host-side / data-dependent and are not part of the kernel.
    VOCAB = 320          # deliberately NOT a multiple of LM_TV: exercises vocab padding+masking
    MAX_SEQLEN = 16
    BLOCKLAYERS = 2
    EMBED_DIM = 32
    NUM_HEADS = 4
    B, L = 2, 8

    root = jax.random.PRNGKey(0)
    k_params, k_ids, k_tgt = jax.random.split(root, 3)
    params = init_params(k_params, VOCAB, MAX_SEQLEN, EMBED_DIM, NUM_HEADS, BLOCKLAYERS)

    input_ids = jax.random.randint(k_ids, (B, L), 0, VOCAB, dtype=jnp.int32)
    targets = jax.random.randint(k_tgt, (B, L), 0, VOCAB, dtype=jnp.int32)

    fwd = jax.jit(functools.partial(toygpt_forward, num_heads=NUM_HEADS, vocab_size=VOCAB))
    logits, loss = fwd(params, input_ids, targets)
    jax.block_until_ready((logits, loss))

    assert logits.shape == (B, L, VOCAB)
    assert loss.shape == ()
    assert bool(jnp.isfinite(loss))
    assert bool(jnp.all(jnp.isfinite(logits)))

    # Loose check against a pure-JAX reference (same bf16-stored weights; the kernel
    # additionally rounds activations/residual stream to bf16, so tolerances are generous).
    ref_logits, ref_loss = toygpt_reference(params, input_ids, targets, NUM_HEADS, VOCAB)
    assert bool(jnp.allclose(loss, ref_loss, rtol=2e-2, atol=2e-2)), (loss, ref_loss)
    assert bool(jnp.allclose(logits, ref_logits, atol=3e-2))

    print("KERNEL_OK")
</pallas_src>

<mosaic_0001>
module attributes {stable_mosaic.version = 11 : i64} {
  func.func @lm_head_kernel(%arg0: i32, %arg1: memref<16x32xbf16, #tpu.memory_space<vmem>>, %arg2: memref<1x32xf32, #tpu.memory_space<vmem>>, %arg3: memref<32x256xbf16, #tpu.memory_space<vmem>>, %arg4: memref<16x1xi32, #tpu.memory_space<vmem>>, %arg5: memref<16x256xbf16, #tpu.memory_space<vmem>>, %arg6: memref<16x1xf32, #tpu.memory_space<vmem>>, %arg7: memref<16x32xbf16, #tpu.memory_space<vmem>>, %arg8: memref<16x1xf32, #tpu.memory_space<vmem>>, %arg9: memref<16x1xf32, #tpu.memory_space<vmem>>, %arg10: memref<16x1xf32, #tpu.memory_space<vmem>>) attributes {dimension_semantics = [#tpu.dimension_semantics<arbitrary>], iteration_bounds = array<i64: 2>, scalar_prefetch = 0 : i64, scratch_operands = 4 : i64, tpu.core_type = #tpu.core_type<tc>, window_params = [{pipeline_mode = #tpu.pipeline_mode<synchronous>, transform_indices = @transform_0, window_bounds = array<i64: 16, 32>}, {pipeline_mode = #tpu.pipeline_mode<synchronous>, transform_indices = @transform_1, window_bounds = array<i64: 1, 32>}, {transform_indices = @transform_2, window_bounds = array<i64: 32, 256>}, {pipeline_mode = #tpu.pipeline_mode<synchronous>, transform_indices = @transform_3, window_bounds = array<i64: 16, 1>}, {transform_indices = @transform_4, window_bounds = array<i64: 16, 256>}, {pipeline_mode = #tpu.pipeline_mode<synchronous>, transform_indices = @transform_5, window_bounds = array<i64: 16, 1>}]} {
    %c0_i32 = arith.constant 0 : i32
    %0 = arith.cmpi eq, %arg0, %c0_i32 : i32
    %1 = arith.extui %0 : i1 to i32
    %c0_i32_0 = arith.constant 0 : i32
    %2 = arith.cmpi ne, %1, %c0_i32_0 : i32
    scf.if %2 {
      %c0_26 = arith.constant 0 : index
      %c0_27 = arith.constant 0 : index
      %45 = vector.load %arg1[%c0_26, %c0_27] : memref<16x32xbf16, #tpu.memory_space<vmem>>, vector<16x32xbf16>
      %46 = arith.extf %45 : vector<16x32xbf16> to vector<16x32xf32>
      %c0_28 = arith.constant 0 : index
      %c0_29 = arith.constant 0 : index
      %47 = vector.load %arg2[%c0_28, %c0_29] : memref<1x32xf32, #tpu.memory_space<vmem>>, vector<1x32xf32>
      %cst_30 = arith.constant dense<0.000000e+00> : vector<16xf32>
      %48 = vector.multi_reduction <add>, %46, %cst_30 [1] : vector<16x32xf32> to vector<16xf32>
      %49 = vector.shape_cast %48 : vector<16xf32> to vector<16x1xf32>
      %cst_31 = arith.constant 3.200000e+01 : f32
      %50 = vector.broadcast %cst_31 : f32 to vector<16x1xf32>
      %51 = arith.divf %49, %50 : vector<16x1xf32>
      %52 = vector.broadcast %51 : vector<16x1xf32> to vector<16x32xf32>
      %53 = arith.subf %46, %52 : vector<16x32xf32>
      %54 = arith.mulf %53, %53 : vector<16x32xf32>
      %cst_32 = arith.constant dense<0.000000e+00> : vector<16xf32>
      %55 = vector.multi_reduction <add>, %54, %cst_32 [1] : vector<16x32xf32> to vector<16xf32>
      %56 = vector.shape_cast %55 : vector<16xf32> to vector<16x1xf32>
      %cst_33 = arith.constant 3.200000e+01 : f32
      %57 = vector.broadcast %cst_33 : f32 to vector<16x1xf32>
      %58 = arith.divf %56, %57 : vector<16x1xf32>
      %cst_34 = arith.constant 9.99999974E-6 : f32
      %59 = vector.broadcast %cst_34 : f32 to vector<16x1xf32>
      %60 = arith.addf %58, %59 : vector<16x1xf32>
      %61 = math.rsqrt %60 : vector<16x1xf32>
      %62 = vector.broadcast %61 : vector<16x1xf32> to vector<16x32xf32>
      %63 = arith.mulf %53, %62 : vector<16x32xf32>
      %64 = vector.broadcast %47 : vector<1x32xf32> to vector<16x32xf32>
      %65 = arith.mulf %63, %64 : vector<16x32xf32>
      %66 = arith.truncf %65 : vector<16x32xf32> to vector<16x32xbf16>
      %c0_35 = arith.constant 0 : index
      %c0_36 = arith.constant 0 : index
      %67 = vector.load %arg7[%c0_35, %c0_36] : memref<16x32xbf16, #tpu.memory_space<vmem>>, vector<16x32xbf16>
      tpu.vector_store %arg7[%c0_35, %c0_36], %66 {strides = array<i32>} : memref<16x32xbf16, #tpu.memory_space<vmem>>, vector<16x32xbf16>,
      %cst_37 = arith.constant -1.000000e+30 : f32
      %68 = vector.broadcast %cst_37 : f32 to vector<16x1xf32>
      %c0_38 = arith.constant 0 : index
      %c0_39 = arith.constant 0 : index
      %69 = vector.load %arg8[%c0_38, %c0_39] : memref<16x1xf32, #tpu.memory_space<vmem>>, vector<16x1xf32>
      tpu.vector_store %arg8[%c0_38, %c0_39], %68 {strides = array<i32>} : memref<16x1xf32, #tpu.memory_space<vmem>>, vector<16x1xf32>,
      %cst_40 = arith.constant 0.000000e+00 : f32
      %70 = vector.broadcast %cst_40 : f32 to vector<16x1xf32>
      %c0_41 = arith.constant 0 : index
      %c0_42 = arith.constant 0 : index
      %71 = vector.load %arg9[%c0_41, %c0_42] : memref<16x1xf32, #tpu.memory_space<vmem>>, vector<16x1xf32>
      tpu.vector_store %arg9[%c0_41, %c0_42], %70 {strides = array<i32>} : memref<16x1xf32, #tpu.memory_space<vmem>>, vector<16x1xf32>,
      %cst_43 = arith.constant 0.000000e+00 : f32
      %72 = vector.broadcast %cst_43 : f32 to vector<16x1xf32>
      %c0_44 = arith.constant 0 : index
      %c0_45 = arith.constant 0 : index
      %73 = vector.load %arg10[%c0_44, %c0_45] : memref<16x1xf32, #tpu.memory_space<vmem>>, vector<16x1xf32>
      tpu.vector_store %arg10[%c0_44, %c0_45], %72 {strides = array<i32>} : memref<16x1xf32, #tpu.memory_space<vmem>>, vector<16x1xf32>,
    } else {
    }
    %c0 = arith.constant 0 : index
    %c0_1 = arith.constant 0 : index
    %3 = vector.load %arg7[%c0, %c0_1] : memref<16x32xbf16, #tpu.memory_space<vmem>>, vector<16x32xbf16>
    %c0_2 = arith.constant 0 : index
    %c0_3 = arith.constant 0 : index
    %4 = vector.load %arg3[%c0_2, %c0_3] : memref<32x256xbf16, #tpu.memory_space<vmem>>, vector<32x256xbf16>
    %cst = arith.constant dense<0.000000e+00> : vector<16x256xf32>
    %5 = tpu.matmul %3, %4, %cst {dimension_numbers = #tpu.dot_dimension_numbers<[1], [0], [0], [1], [0, 0, 1, 1], [], []>} : vector<16x32xbf16>, vector<32x256xbf16>, vector<16x256xf32> -> vector<16x256xf32>
    %6 = arith.truncf %5 : vector<16x256xf32> to vector<16x256xbf16>
    %c0_4 = arith.constant 0 : index
    %c0_5 = arith.constant 0 : index
    %7 = vector.load %arg5[%c0_4, %c0_5] : memref<16x256xbf16, #tpu.memory_space<vmem>>, vector<16x256xbf16>
    tpu.vector_store %arg5[%c0_4, %c0_5], %6 {strides = array<i32>} : memref<16x256xbf16, #tpu.memory_space<vmem>>, vector<16x256xbf16>,
    %c256_i32 = arith.constant 256 : i32
    %8 = arith.muli %arg0, %c256_i32 : i32
    %9 = tpu.iota {dimensions = array<i32: 1>} : vector<16x256xi32>
    %10 = vector.broadcast %8 : i32 to vector<16x256xi32>
    %11 = arith.addi %10, %9 : vector<16x256xi32>
    %c320_i32 = arith.constant 320 : i32
    %12 = vector.broadcast %c320_i32 : i32 to vector<16x256xi32>
    %13 = arith.cmpi slt, %11, %12 : vector<16x256xi32>
    %cst_6 = arith.constant -1.000000e+30 : f32
    %14 = vector.broadcast %cst_6 : f32 to vector<16x256xf32>
    %15 = arith.select %13, %5, %14 : vector<16x256xi1>, vector<16x256xf32>
    %c0_7 = arith.constant 0 : index
    %c0_8 = arith.constant 0 : index
    %16 = vector.load %arg4[%c0_7, %c0_8] : memref<16x1xi32, #tpu.memory_space<vmem>>, vector<16x1xi32>
    %c0_9 = arith.constant 0 : index
    %c0_10 = arith.constant 0 : index
    %17 = vector.load %arg10[%c0_9, %c0_10] : memref<16x1xf32, #tpu.memory_space<vmem>>, vector<16x1xf32>
    %18 = vector.broadcast %16 : vector<16x1xi32> to vector<16x256xi32>
    %19 = arith.cmpi eq, %11, %18 : vector<16x256xi32>
    %cst_11 = arith.constant 0.000000e+00 : f32
    %20 = vector.broadcast %cst_11 : f32 to vector<16x256xf32>
    %21 = arith.select %19, %5, %20 : vector<16x256xi1>, vector<16x256xf32>
    %cst_12 = arith.constant dense<0.000000e+00> : vector<16xf32>
    %22 = vector.multi_reduction <add>, %21, %cst_12 [1] : vector<16x256xf32> to vector<16xf32>
    %23 = vector.shape_cast %22 : vector<16xf32> to vector<16x1xf32>
    %24 = arith.addf %17, %23 : vector<16x1xf32>
    %c0_13 = arith.constant 0 : index
    %c0_14 = arith.constant 0 : index
    %25 = vector.load %arg10[%c0_13, %c0_14] : memref<16x1xf32, #tpu.memory_space<vmem>>, vector<16x1xf32>
    tpu.vector_store %arg10[%c0_13, %c0_14], %24 {strides = array<i32>} : memref<16x1xf32, #tpu.memory_space<vmem>>, vector<16x1xf32>,
    %c0_15 = arith.constant 0 : index
    %c0_16 = arith.constant 0 : index
    %26 = vector.load %arg8[%c0_15, %c0_16] : memref<16x1xf32, #tpu.memory_space<vmem>>, vector<16x1xf32>
    %cst_17 = arith.constant dense<0xFF800000> : vector<16xf32>
    %27 = vector.multi_reduction <maximumf>, %15, %cst_17 [1] : vector<16x256xf32> to vector<16xf32>
    %28 = vector.shape_cast %27 : vector<16xf32> to vector<16x1xf32>
    %29 = arith.maximumf %26, %28 : vector<16x1xf32>
    %c0_18 = arith.constant 0 : index
    %c0_19 = arith.constant 0 : index
    %30 = vector.load %arg9[%c0_18, %c0_19] : memref<16x1xf32, #tpu.memory_space<vmem>>, vector<16x1xf32>
    %31 = arith.subf %26, %29 : vector<16x1xf32>
    %32 = math.exp %31 : vector<16x1xf32>
    %33 = arith.mulf %30, %32 : vector<16x1xf32>
    %34 = vector.broadcast %29 : vector<16x1xf32> to vector<16x256xf32>
    %35 = arith.subf %15, %34 : vector<16x256xf32>
    %36 = math.exp %35 : vector<16x256xf32>
    %cst_20 = arith.constant dense<0.000000e+00> : vector<16xf32>
    %37 = vector.multi_reduction <add>, %36, %cst_20 [1] : vector<16x256xf32> to vector<16xf32>
    %38 = vector.shape_cast %37 : vector<16xf32> to vector<16x1xf32>
    %39 = arith.addf %33, %38 : vector<16x1xf32>
    %c0_21 = arith.constant 0 : index
    %c0_22 = arith.constant 0 : index
    %40 = vector.load %arg9[%c0_21, %c0_22] : memref<16x1xf32, #tpu.memory_space<vmem>>, vector<16x1xf32>
    tpu.vector_store %arg9[%c0_21, %c0_22], %39 {strides = array<i32>} : memref<16x1xf32, #tpu.memory_space<vmem>>, vector<16x1xf32>,
    %c0_23 = arith.constant 0 : index
    %c0_24 = arith.constant 0 : index
    %41 = vector.load %arg8[%c0_23, %c0_24] : memref<16x1xf32, #tpu.memory_space<vmem>>, vector<16x1xf32>
    tpu.vector_store %arg8[%c0_23, %c0_24], %29 {strides = array<i32>} : memref<16x1xf32, #tpu.memory_space<vmem>>, vector<16x1xf32>,
    %c1_i32 = arith.constant 1 : i32
    %42 = arith.cmpi eq, %arg0, %c1_i32 : i32
    %43 = arith.extui %42 : i1 to i32
    %c0_i32_25 = arith.constant 0 : i32
    %44 = arith.cmpi ne, %43, %c0_i32_25 : i32
    scf.if %44 {
      %c0_26 = arith.constant 0 : index
      %c0_27 = arith.constant 0 : index
      %45 = vector.load %arg8[%c0_26, %c0_27] : memref<16x1xf32, #tpu.memory_space<vmem>>, vector<16x1xf32>
      %c0_28 = arith.constant 0 : index
      %c0_29 = arith.constant 0 : index
      %46 = vector.load %arg9[%c0_28, %c0_29] : memref<16x1xf32, #tpu.memory_space<vmem>>, vector<16x1xf32>
      %47 = math.log %46 : vector<16x1xf32>
      %48 = arith.addf %45, %47 : vector<16x1xf32>
      %c0_30 = arith.constant 0 : index
      %c0_31 = arith.constant 0 : index
      %49 = vector.load %arg10[%c0_30, %c0_31] : memref<16x1xf32, #tpu.memory_space<vmem>>, vector<16x1xf32>
      %50 = arith.subf %48, %49 : vector<16x1xf32>
      %c0_32 = arith.constant 0 : index
      %c0_33 = arith.constant 0 : index
      %51 = vector.load %arg6[%c0_32, %c0_33] : memref<16x1xf32, #tpu.memory_space<vmem>>, vector<16x1xf32>
      tpu.vector_store %arg6[%c0_32, %c0_33], %50 {strides = array<i32>} : memref<16x1xf32, #tpu.memory_space<vmem>>, vector<16x1xf32>,
    } else {
    }
    return
  }
  func.func @transform_0(%arg0: i32) -> (i32, i32) {
    %c0_i32 = arith.constant 0 : i32
    %c0_i32_0 = arith.constant 0 : i32
    %c0_i32_1 = arith.constant 0 : i32
    return %c0_i32, %c0_i32_0 : i32, i32
  }
  func.func @transform_1(%arg0: i32) -> (i32, i32) {
    %c0_i32 = arith.constant 0 : i32
    %c0_i32_0 = arith.constant 0 : i32
    %c0_i32_1 = arith.constant 0 : i32
    return %c0_i32, %c0_i32_0 : i32, i32
  }
  func.func @transform_2(%arg0: i32) -> (i32, i32) {
    %c0_i32 = arith.constant 0 : i32
    %c0_i32_0 = arith.constant 0 : i32
    return %c0_i32, %arg0 : i32, i32
  }
  func.func @transform_3(%arg0: i32) -> (i32, i32) {
    %c0_i32 = arith.constant 0 : i32
    %c0_i32_0 = arith.constant 0 : i32
    %c0_i32_1 = arith.constant 0 : i32
    return %c0_i32, %c0_i32_0 : i32, i32
  }
  func.func @transform_4(%arg0: i32) -> (i32, i32) {
    %c0_i32 = arith.constant 0 : i32
    %c0_i32_0 = arith.constant 0 : i32
    return %c0_i32, %arg0 : i32, i32
  }
  func.func @transform_5(%arg0: i32) -> (i32, i32) {
    %c0_i32 = arith.constant 0 : i32
    %c0_i32_0 = arith.constant 0 : i32
    %c0_i32_1 = arith.constant 0 : i32
    return %c0_i32, %c0_i32_0 : i32, i32
  }
}

module attributes {stable_mosaic.version = 11 : i64} {
  func.func @transformer_block_kernel(%arg0: i32, %arg1: memref<1x8x32xbf16, #tpu.memory_space<vmem>>, %arg2: memref<1x32xf32, #tpu.memory_space<vmem>>, %arg3: memref<1x32xf32, #tpu.memory_space<vmem>>, %arg4: memref<32x96xbf16, #tpu.memory_space<vmem>>, %arg5: memref<32x32xbf16, #tpu.memory_space<vmem>>, %arg6: memref<1x32xf32, #tpu.memory_space<vmem>>, %arg7: memref<1x32xf32, #tpu.memory_space<vmem>>, %arg8: memref<32x128xbf16, #tpu.memory_space<vmem>>, %arg9: memref<1x128xf32, #tpu.memory_space<vmem>>, %arg10: memref<128x32xbf16, #tpu.memory_space<vmem>>, %arg11: memref<1x32xf32, #tpu.memory_space<vmem>>, %arg12: memref<1x8x32xbf16, #tpu.memory_space<vmem>>) attributes {dimension_semantics = [#tpu.dimension_semantics<parallel>], iteration_bounds = array<i64: 2>, scalar_prefetch = 0 : i64, scratch_operands = 0 : i64, tpu.core_type = #tpu.core_type<tc>, window_params = [{transform_indices = @transform_0, window_bounds = array<i64: 1, 8, 32>}, {pipeline_mode = #tpu.pipeline_mode<synchronous>, transform_indices = @transform_1, window_bounds = array<i64: 1, 32>}, {pipeline_mode = #tpu.pipeline_mode<synchronous>, transform_indices = @transform_2, window_bounds = array<i64: 1, 32>}, {pipeline_mode = #tpu.pipeline_mode<synchronous>, transform_indices = @transform_3, window_bounds = array<i64: 32, 96>}, {pipeline_mode = #tpu.pipeline_mode<synchronous>, transform_indices = @transform_4, window_bounds = array<i64: 32, 32>}, {pipeline_mode = #tpu.pipeline_mode<synchronous>, transform_indices = @transform_5, window_bounds = array<i64: 1, 32>}, {pipeline_mode = #tpu.pipeline_mode<synchronous>, transform_indices = @transform_6, window_bounds = array<i64: 1, 32>}, {pipeline_mode = #tpu.pipeline_mode<synchronous>, transform_indices = @transform_7, window_bounds = array<i64: 32, 128>}, {pipeline_mode = #tpu.pipeline_mode<synchronous>, transform_indices = @transform_8, window_bounds = array<i64: 1, 128>}, {pipeline_mode = #tpu.pipeline_mode<synchronous>, transform_indices = @transform_9, window_bounds = array<i64: 128, 32>}, {pipeline_mode = #tpu.pipeline_mode<synchronous>, transform_indices = @transform_10, window_bounds = array<i64: 1, 32>}, {transform_indices = @transform_11, window_bounds = array<i64: 1, 8, 32>}]} {
    %c0 = arith.constant 0 : index
    %c0_0 = arith.constant 0 : index
    %c0_1 = arith.constant 0 : index
    %0 = vector.load %arg1[%c0, %c0_0, %c0_1] : memref<1x8x32xbf16, #tpu.memory_space<vmem>>, vector<1x8x32xbf16>
    %1 = vector.shape_cast %0 : vector<1x8x32xbf16> to vector<8x32xbf16>
    %2 = arith.extf %1 : vector<8x32xbf16> to vector<8x32xf32>
    %c0_2 = arith.constant 0 : index
    %c0_3 = arith.constant 0 : index
    %3 = vector.load %arg2[%c0_2, %c0_3] : memref<1x32xf32, #tpu.memory_space<vmem>>, vector<1x32xf32>
    %c0_4 = arith.constant 0 : index
    %c0_5 = arith.constant 0 : index
    %4 = vector.load %arg3[%c0_4, %c0_5] : memref<1x32xf32, #tpu.memory_space<vmem>>, vector<1x32xf32>
    %cst = arith.constant dense<0.000000e+00> : vector<8xf32>
    %5 = vector.multi_reduction <add>, %2, %cst [1] : vector<8x32xf32> to vector<8xf32>
    %6 = vector.shape_cast %5 : vector<8xf32> to vector<8x1xf32>
    %cst_6 = arith.constant 3.200000e+01 : f32
    %7 = vector.broadcast %cst_6 : f32 to vector<8x1xf32>
    %8 = arith.divf %6, %7 : vector<8x1xf32>
    %9 = vector.broadcast %8 : vector<8x1xf32> to vector<8x32xf32>
    %10 = arith.subf %2, %9 : vector<8x32xf32>
    %11 = arith.mulf %10, %10 : vector<8x32xf32>
    %cst_7 = arith.constant dense<0.000000e+00> : vector<8xf32>
    %12 = vector.multi_reduction <add>, %11, %cst_7 [1] : vector<8x32xf32> to vector<8xf32>
    %13 = vector.shape_cast %12 : vector<8xf32> to vector<8x1xf32>
    %cst_8 = arith.constant 3.200000e+01 : f32
    %14 = vector.broadcast %cst_8 : f32 to vector<8x1xf32>
    %15 = arith.divf %13, %14 : vector<8x1xf32>
    %cst_9 = arith.constant 9.99999974E-6 : f32
    %16 = vector.broadcast %cst_9 : f32 to vector<8x1xf32>
    %17 = arith.addf %15, %16 : vector<8x1xf32>
    %18 = math.rsqrt %17 : vector<8x1xf32>
    %19 = vector.broadcast %18 : vector<8x1xf32> to vector<8x32xf32>
    %20 = arith.mulf %10, %19 : vector<8x32xf32>
    %21 = vector.broadcast %3 : vector<1x32xf32> to vector<8x32xf32>
    %22 = arith.mulf %20, %21 : vector<8x32xf32>
    %23 = vector.broadcast %4 : vector<1x32xf32> to vector<8x32xf32>
    %24 = arith.addf %22, %23 : vector<8x32xf32>
    %25 = arith.truncf %24 : vector<8x32xf32> to vector<8x32xbf16>
    %c0_10 = arith.constant 0 : index
    %c0_11 = arith.constant 0 : index
    %26 = vector.load %arg4[%c0_10, %c0_11] : memref<32x96xbf16, #tpu.memory_space<vmem>>, vector<32x96xbf16>
    %cst_12 = arith.constant dense<0.000000e+00> : vector<8x96xf32>
    %27 = tpu.matmul %25, %26, %cst_12 {dimension_numbers = #tpu.dot_dimension_numbers<[1], [0], [0], [1], [0, 0, 1, 1], [], []>} : vector<8x32xbf16>, vector<32x96xbf16>, vector<8x96xf32> -> vector<8x96xf32>
    %28 = arith.truncf %27 : vector<8x96xf32> to vector<8x96xbf16>
    %29 = vector.extract_strided_slice %28 {offsets = [0, 0], sizes = [8, 32], strides = [1, 1]} : vector<8x96xbf16> to vector<8x32xbf16>
    %30 = vector.extract_strided_slice %29 {offsets = [0, 0], sizes = [8, 8], strides = [1, 1]} : vector<8x32xbf16> to vector<8x8xbf16>
    %31 = vector.extract_strided_slice %29 {offsets = [0, 8], sizes = [8, 8], strides = [1, 1]} : vector<8x32xbf16> to vector<8x8xbf16>
    %32 = vector.extract_strided_slice %29 {offsets = [0, 16], sizes = [8, 8], strides = [1, 1]} : vector<8x32xbf16> to vector<8x8xbf16>
    %33 = vector.extract_strided_slice %29 {offsets = [0, 24], sizes = [8, 8], strides = [1, 1]} : vector<8x32xbf16> to vector<8x8xbf16>
    %34 = vector.shape_cast %30 : vector<8x8xbf16> to vector<1x8x8xbf16>
    %35 = vector.shape_cast %31 : vector<8x8xbf16> to vector<1x8x8xbf16>
    %36 = vector.shape_cast %32 : vector<8x8xbf16> to vector<1x8x8xbf16>
    %37 = vector.shape_cast %33 : vector<8x8xbf16> to vector<1x8x8xbf16>
    %38 = tpu.concatenate %34, %35, %36, %37 in 0 : vector<1x8x8xbf16>, vector<1x8x8xbf16>, vector<1x8x8xbf16>, vector<1x8x8xbf16> -> vector<4x8x8xbf16>
    %39 = vector.extract_strided_slice %28 {offsets = [0, 32], sizes = [8, 32], strides = [1, 1]} : vector<8x96xbf16> to vector<8x32xbf16>
    %40 = vector.extract_strided_slice %39 {offsets = [0, 0], sizes = [8, 8], strides = [1, 1]} : vector<8x32xbf16> to vector<8x8xbf16>
    %41 = vector.extract_strided_slice %39 {offsets = [0, 8], sizes = [8, 8], strides = [1, 1]} : vector<8x32xbf16> to vector<8x8xbf16>
    %42 = vector.extract_strided_slice %39 {offsets = [0, 16], sizes = [8, 8], strides = [1, 1]} : vector<8x32xbf16> to vector<8x8xbf16>
    %43 = vector.extract_strided_slice %39 {offsets = [0, 24], sizes = [8, 8], strides = [1, 1]} : vector<8x32xbf16> to vector<8x8xbf16>
    %44 = vector.shape_cast %40 : vector<8x8xbf16> to vector<1x8x8xbf16>
    %45 = vector.shape_cast %41 : vector<8x8xbf16> to vector<1x8x8xbf16>
    %46 = vector.shape_cast %42 : vector<8x8xbf16> to vector<1x8x8xbf16>
    %47 = vector.shape_cast %43 : vector<8x8xbf16> to vector<1x8x8xbf16>
    %48 = tpu.concatenate %44, %45, %46, %47 in 0 : vector<1x8x8xbf16>, vector<1x8x8xbf16>, vector<1x8x8xbf16>, vector<1x8x8xbf16> -> vector<4x8x8xbf16>
    %49 = vector.extract_strided_slice %28 {offsets = [0, 64], sizes = [8, 32], strides = [1, 1]} : vector<8x96xbf16> to vector<8x32xbf16>
    %50 = vector.extract_strided_slice %49 {offsets = [0, 0], sizes = [8, 8], strides = [1, 1]} : vector<8x32xbf16> to vector<8x8xbf16>
    %51 = vector.extract_strided_slice %49 {offsets = [0, 8], sizes = [8, 8], strides = [1, 1]} : vector<8x32xbf16> to vector<8x8xbf16>
    %52 = vector.extract_strided_slice %49 {offsets = [0, 16], sizes = [8, 8], strides = [1, 1]} : vector<8x32xbf16> to vector<8x8xbf16>
    %53 = vector.extract_strided_slice %49 {offsets = [0, 24], sizes = [8, 8], strides = [1, 1]} : vector<8x32xbf16> to vector<8x8xbf16>
    %54 = vector.shape_cast %50 : vector<8x8xbf16> to vector<1x8x8xbf16>
    %55 = vector.shape_cast %51 : vector<8x8xbf16> to vector<1x8x8xbf16>
    %56 = vector.shape_cast %52 : vector<8x8xbf16> to vector<1x8x8xbf16>
    %57 = vector.shape_cast %53 : vector<8x8xbf16> to vector<1x8x8xbf16>
    %58 = tpu.concatenate %54, %55, %56, %57 in 0 : vector<1x8x8xbf16>, vector<1x8x8xbf16>, vector<1x8x8xbf16>, vector<1x8x8xbf16> -> vector<4x8x8xbf16>
    "tpu.trace_start"() <{level = 10 : i32, message = "hqd,hkd->hqk"}> : () -> ()
    %cst_13 = arith.constant dense<0.000000e+00> : vector<4x8x8xf32>
    %59 = tpu.matmul %38, %48, %cst_13 {dimension_numbers = #tpu.dot_dimension_numbers<[2], [2], [1], [1], [0, 0, 0, 1, 1, 1], [0], [0]>} : vector<4x8x8xbf16>, vector<4x8x8xbf16>, vector<4x8x8xf32> -> vector<4x8x8xf32>
    "tpu.trace_stop"() : () -> ()
    %cst_14 = arith.constant 0.353553385 : f32
    %60 = vector.broadcast %cst_14 : f32 to vector<4x8x8xf32>
    %61 = arith.mulf %59, %60 : vector<4x8x8xf32>
    %62 = tpu.iota {dimensions = array<i32: 0>} : vector<8x8xi32>
    %63 = tpu.iota {dimensions = array<i32: 1>} : vector<8x8xi32>
    %64 = arith.cmpi sge, %62, %63 : vector<8x8xi32>
    %65 = vector.shape_cast %64 : vector<8x8xi1> to vector<1x8x8xi1>
    %cst_15 = arith.constant -1.000000e+30 : f32
    %66 = vector.shape_cast %65 : vector<1x8x8xi1> to vector<1x8x8xi1>
    %67 = vector.broadcast %66 : vector<1x8x8xi1> to vector<4x8x8xi1>
    %68 = vector.broadcast %cst_15 : f32 to vector<4x8x8xf32>
    %69 = arith.select %67, %61, %68 : vector<4x8x8xi1>, vector<4x8x8xf32>
    %cst_16 = arith.constant dense<0xFF800000> : vector<4x8xf32>
    %70 = vector.multi_reduction <maximumf>, %69, %cst_16 [2] : vector<4x8x8xf32> to vector<4x8xf32>
    %71 = vector.shape_cast %70 : vector<4x8xf32> to vector<4x8x1xf32>
    %72 = vector.broadcast %71 : vector<4x8x1xf32> to vector<4x8x8xf32>
    %73 = arith.subf %69, %72 : vector<4x8x8xf32>
    %74 = math.exp %73 : vector<4x8x8xf32>
    %cst_17 = arith.constant dense<0.000000e+00> : vector<4x8xf32>
    %75 = vector.multi_reduction <add>, %74, %cst_17 [2] : vector<4x8x8xf32> to vector<4x8xf32>
    %76 = vector.shape_cast %75 : vector<4x8xf32> to vector<4x8x1xf32>
    %77 = tpu.reciprocal %76 {approx = true} : vector<4x8x1xf32> -> vector<4x8x1xf32>
    %78 = vector.broadcast %77 : vector<4x8x1xf32> to vector<4x8x8xf32>
    %79 = arith.mulf %74, %78 : vector<4x8x8xf32>
    %80 = arith.truncf %79 : vector<4x8x8xf32> to vector<4x8x8xbf16>
    "tpu.trace_start"() <{level = 10 : i32, message = "hqk,hkd->hqd"}> : () -> ()
    %cst_18 = arith.constant dense<0.000000e+00> : vector<4x8x8xf32>
    %81 = tpu.matmul %80, %58, %cst_18 {dimension_numbers = #tpu.dot_dimension_numbers<[2], [1], [1], [2], [0, 0, 0, 1, 1, 2], [0], [0]>} : vector<4x8x8xbf16>, vector<4x8x8xbf16>, vector<4x8x8xf32> -> vector<4x8x8xf32>
    "tpu.trace_stop"() : () -> ()
    %82 = vector.extract_strided_slice %81 {offsets = [0, 0, 0], sizes = [1, 8, 8], strides = [1, 1, 1]} : vector<4x8x8xf32> to vector<1x8x8xf32>
    %83 = vector.shape_cast %82 : vector<1x8x8xf32> to vector<8x8xf32>
    %84 = vector.extract_strided_slice %81 {offsets = [1, 0, 0], sizes = [1, 8, 8], strides = [1, 1, 1]} : vector<4x8x8xf32> to vector<1x8x8xf32>
    %85 = vector.shape_cast %84 : vector<1x8x8xf32> to vector<8x8xf32>
    %86 = vector.extract_strided_slice %81 {offsets = [2, 0, 0], sizes = [1, 8, 8], strides = [1, 1, 1]} : vector<4x8x8xf32> to vector<1x8x8xf32>
    %87 = vector.shape_cast %86 : vector<1x8x8xf32> to vector<8x8xf32>
    %88 = vector.extract_strided_slice %81 {offsets = [3, 0, 0], sizes = [1, 8, 8], strides = [1, 1, 1]} : vector<4x8x8xf32> to vector<1x8x8xf32>
    %89 = vector.shape_cast %88 : vector<1x8x8xf32> to vector<8x8xf32>
    %90 = tpu.concatenate %83, %85, %87, %89 in 1 : vector<8x8xf32>, vector<8x8xf32>, vector<8x8xf32>, vector<8x8xf32> -> vector<8x32xf32>
    %91 = arith.truncf %90 : vector<8x32xf32> to vector<8x32xbf16>
    %c0_19 = arith.constant 0 : index
    %c0_20 = arith.constant 0 : index
    %92 = vector.load %arg5[%c0_19, %c0_20] : memref<32x32xbf16, #tpu.memory_space<vmem>>, vector<32x32xbf16>
    %cst_21 = arith.constant dense<0.000000e+00> : vector<8x32xf32>
    %93 = tpu.matmul %91, %92, %cst_21 {dimension_numbers = #tpu.dot_dimension_numbers<[1], [0], [0], [1], [0, 0, 1, 1], [], []>} : vector<8x32xbf16>, vector<32x32xbf16>, vector<8x32xf32> -> vector<8x32xf32>
    %94 = arith.addf %93, %2 : vector<8x32xf32>
    %c0_22 = arith.constant 0 : index
    %c0_23 = arith.constant 0 : index
    %95 = vector.load %arg6[%c0_22, %c0_23] : memref<1x32xf32, #tpu.memory_space<vmem>>, vector<1x32xf32>
    %c0_24 = arith.constant 0 : index
    %c0_25 = arith.constant 0 : index
    %96 = vector.load %arg7[%c0_24, %c0_25] : memref<1x32xf32, #tpu.memory_space<vmem>>, vector<1x32xf32>
    %cst_26 = arith.constant dense<0.000000e+00> : vector<8xf32>
    %97 = vector.multi_reduction <add>, %94, %cst_26 [1] : vector<8x32xf32> to vector<8xf32>
    %98 = vector.shape_cast %97 : vector<8xf32> to vector<8x1xf32>
    %cst_27 = arith.constant 3.200000e+01 : f32
    %99 = vector.broadcast %cst_27 : f32 to vector<8x1xf32>
    %100 = arith.divf %98, %99 : vector<8x1xf32>
    %101 = vector.broadcast %100 : vector<8x1xf32> to vector<8x32xf32>
    %102 = arith.subf %94, %101 : vector<8x32xf32>
    %103 = arith.mulf %102, %102 : vector<8x32xf32>
    %cst_28 = arith.constant dense<0.000000e+00> : vector<8xf32>
    %104 = vector.multi_reduction <add>, %103, %cst_28 [1] : vector<8x32xf32> to vector<8xf32>
    %105 = vector.shape_cast %104 : vector<8xf32> to vector<8x1xf32>
    %cst_29 = arith.constant 3.200000e+01 : f32
    %106 = vector.broadcast %cst_29 : f32 to vector<8x1xf32>
    %107 = arith.divf %105, %106 : vector<8x1xf32>
    %cst_30 = arith.constant 9.99999974E-6 : f32
    %108 = vector.broadcast %cst_30 : f32 to vector<8x1xf32>
    %109 = arith.addf %107, %108 : vector<8x1xf32>
    %110 = math.rsqrt %109 : vector<8x1xf32>
    %111 = vector.broadcast %110 : vector<8x1xf32> to vector<8x32xf32>
    %112 = arith.mulf %102, %111 : vector<8x32xf32>
    %113 = vector.broadcast %95 : vector<1x32xf32> to vector<8x32xf32>
    %114 = arith.mulf %112, %113 : vector<8x32xf32>
    %115 = vector.broadcast %96 : vector<1x32xf32> to vector<8x32xf32>
    %116 = arith.addf %114, %115 : vector<8x32xf32>
    %117 = arith.truncf %116 : vector<8x32xf32> to vector<8x32xbf16>
    %c0_31 = arith.constant 0 : index
    %c0_32 = arith.constant 0 : index
    %118 = vector.load %arg8[%c0_31, %c0_32] : memref<32x128xbf16, #tpu.memory_space<vmem>>, vector<32x128xbf16>
    %cst_33 = arith.constant dense<0.000000e+00> : vector<8x128xf32>
    %119 = tpu.matmul %117, %118, %cst_33 {dimension_numbers = #tpu.dot_dimension_numbers<[1], [0], [0], [1], [0, 0, 1, 1], [], []>} : vector<8x32xbf16>, vector<32x128xbf16>, vector<8x128xf32> -> vector<8x128xf32>
    %c0_34 = arith.constant 0 : index
    %c0_35 = arith.constant 0 : index
    %120 = vector.load %arg9[%c0_34, %c0_35] : memref<1x128xf32, #tpu.memory_space<vmem>>, vector<1x128xf32>
    %121 = vector.broadcast %120 : vector<1x128xf32> to vector<8x128xf32>
    %122 = arith.addf %119, %121 : vector<8x128xf32>
    %123 = arith.mulf %122, %122 : vector<8x128xf32>
    %124 = arith.mulf %122, %123 : vector<8x128xf32>
    %cst_36 = arith.constant 4.471500e-02 : f32
    %125 = vector.broadcast %cst_36 : f32 to vector<8x128xf32>
    %126 = arith.mulf %125, %124 : vector<8x128xf32>
    %127 = arith.addf %122, %126 : vector<8x128xf32>
    %cst_37 = arith.constant 0.797884583 : f32
    %128 = vector.broadcast %cst_37 : f32 to vector<8x128xf32>
    %129 = arith.mulf %128, %127 : vector<8x128xf32>
    %130 = math.tanh %129 : vector<8x128xf32>
    %cst_38 = arith.constant 1.000000e+00 : f32
    %131 = vector.broadcast %cst_38 : f32 to vector<8x128xf32>
    %132 = arith.addf %131, %130 : vector<8x128xf32>
    %cst_39 = arith.constant 5.000000e-01 : f32
    %133 = vector.broadcast %cst_39 : f32 to vector<8x128xf32>
    %134 = arith.mulf %133, %132 : vector<8x128xf32>
    %135 = arith.mulf %122, %134 : vector<8x128xf32>
    %136 = arith.truncf %135 : vector<8x128xf32> to vector<8x128xbf16>
    %c0_40 = arith.constant 0 : index
    %c0_41 = arith.constant 0 : index
    %137 = vector.load %arg10[%c0_40, %c0_41] : memref<128x32xbf16, #tpu.memory_space<vmem>>, vector<128x32xbf16>
    %cst_42 = arith.constant dense<0.000000e+00> : vector<8x32xf32>
    %138 = tpu.matmul %136, %137, %cst_42 {dimension_numbers = #tpu.dot_dimension_numbers<[1], [0], [0], [1], [0, 0, 1, 1], [], []>} : vector<8x128xbf16>, vector<128x32xbf16>, vector<8x32xf32> -> vector<8x32xf32>
    %c0_43 = arith.constant 0 : index
    %c0_44 = arith.constant 0 : index
    %139 = vector.load %arg11[%c0_43, %c0_44] : memref<1x32xf32, #tpu.memory_space<vmem>>, vector<1x32xf32>
    %140 = vector.broadcast %139 : vector<1x32xf32> to vector<8x32xf32>
    %141 = arith.addf %138, %140 : vector<8x32xf32>
    %142 = arith.addf %141, %94 : vector<8x32xf32>
    %143 = arith.truncf %142 : vector<8x32xf32> to vector<8x32xbf16>
    %c0_45 = arith.constant 0 : index
    %c0_46 = arith.constant 0 : index
    %c0_47 = arith.constant 0 : index
    %144 = vector.load %arg12[%c0_45, %c0_46, %c0_47] : memref<1x8x32xbf16, #tpu.memory_space<vmem>>, vector<1x8x32xbf16>
    %145 = vector.shape_cast %144 : vector<1x8x32xbf16> to vector<8x32xbf16>
    %146 = vector.shape_cast %143 : vector<8x32xbf16> to vector<1x8x32xbf16>
    tpu.vector_store %arg12[%c0_45, %c0_46, %c0_47], %146 {strides = array<i32>} : memref<1x8x32xbf16, #tpu.memory_space<vmem>>, vector<1x8x32xbf16>,
    return
  }
  func.func @transform_0(%arg0: i32) -> (i32, i32, i32) {
    %c0_i32 = arith.constant 0 : i32
    %c0_i32_0 = arith.constant 0 : i32
    %c0_i32_1 = arith.constant 0 : i32
    return %arg0, %c0_i32, %c0_i32_0 : i32, i32, i32
  }
  func.func @transform_1(%arg0: i32) -> (i32, i32) {
    %c0_i32 = arith.constant 0 : i32
    %c0_i32_0 = arith.constant 0 : i32
    %c0_i32_1 = arith.constant 0 : i32
    return %c0_i32, %c0_i32_0 : i32, i32
  }
  func.func @transform_2(%arg0: i32) -> (i32, i32) {
    %c0_i32 = arith.constant 0 : i32
    %c0_i32_0 = arith.constant 0 : i32
    %c0_i32_1 = arith.constant 0 : i32
    return %c0_i32, %c0_i32_0 : i32, i32
  }
  func.func @transform_3(%arg0: i32) -> (i32, i32) {
    %c0_i32 = arith.constant 0 : i32
    %c0_i32_0 = arith.constant 0 : i32
    %c0_i32_1 = arith.constant 0 : i32
    return %c0_i32, %c0_i32_0 : i32, i32
  }
  func.func @transform_4(%arg0: i32) -> (i32, i32) {
    %c0_i32 = arith.constant 0 : i32
    %c0_i32_0 = arith.constant 0 : i32
    %c0_i32_1 = arith.constant 0 : i32
    return %c0_i32, %c0_i32_0 : i32, i32
  }
  func.func @transform_5(%arg0: i32) -> (i32, i32) {
    %c0_i32 = arith.constant 0 : i32
    %c0_i32_0 = arith.constant 0 : i32
    %c0_i32_1 = arith.constant 0 : i32
    return %c0_i32, %c0_i32_0 : i32, i32
  }
  func.func @transform_6(%arg0: i32) -> (i32, i32) {
    %c0_i32 = arith.constant 0 : i32
    %c0_i32_0 = arith.constant 0 : i32
    %c0_i32_1 = arith.constant 0 : i32
    return %c0_i32, %c0_i32_0 : i32, i32
  }
  func.func @transform_7(%arg0: i32) -> (i32, i32) {
    %c0_i32 = arith.constant 0 : i32
    %c0_i32_0 = arith.constant 0 : i32
    %c0_i32_1 = arith.constant 0 : i32
    return %c0_i32, %c0_i32_0 : i32, i32
  }
  func.func @transform_8(%arg0: i32) -> (i32, i32) {
    %c0_i32 = arith.constant 0 : i32
    %c0_i32_0 = arith.constant 0 : i32
    %c0_i32_1 = arith.constant 0 : i32
    return %c0_i32, %c0_i32_0 : i32, i32
  }
  func.func @transform_9(%arg0: i32) -> (i32, i32) {
    %c0_i32 = arith.constant 0 : i32
    %c0_i32_0 = arith.constant 0 : i32
    %c0_i32_1 = arith.constant 0 : i32
    return %c0_i32, %c0_i32_0 : i32, i32
  }
  func.func @transform_10(%arg0: i32) -> (i32, i32) {
    %c0_i32 = arith.constant 0 : i32
    %c0_i32_0 = arith.constant 0 : i32
    %c0_i32_1 = arith.constant 0 : i32
    return %c0_i32, %c0_i32_0 : i32, i32
  }
  func.func @transform_11(%arg0: i32) -> (i32, i32, i32) {
    %c0_i32 = arith.constant 0 : i32
    %c0_i32_0 = arith.constant 0 : i32
    %c0_i32_1 = arith.constant 0 : i32
    return %arg0, %c0_i32, %c0_i32_0 : i32, i32, i32
  }
}

</mosaic_0001>

<bundles_post_ra>
// kernel: toygpt_forward.5
= control target key start
LH: loop header
LB: loop body
LE: loop exit
PB: predicated region body
PF: predicated region fallthrough
CT: control target
= control target key end

     0   :  { %s801_s18 = smov 0   ;;  %s803_s19 = smov 0   ;;  %s912_s0 = inlined_call_operand.vmem [shape: bf16[16,32], index: 0, kind: input, shape index: {}]   ;;  %s913_s1 = inlined_call_operand.vmem [shape: f32[1,32], index: 1, kind: input, shape index: {}]   ;;  %s914_s2 = inlined_call_operand.vmem [shape: bf16[32,512], index: 2, kind: input, shape index: {}]   ;;  %s915_s3 = inlined_call_operand.vmem [shape: s32[16,1], index: 3, kind: input, shape index: {}]   ;;  %s916_s4 = inlined_call_operand.vmem [shape: bf16[16,512], index: 4, kind: output, shape index: {0}]   ;;  %s917_s5 = inlined_call_operand.vmem [shape: f32[16,1], index: 5, kind: output, shape index: {1}]  }
   0x1   :  { %s805_s20 = smov 0  }
   0x2 LB: > { %s817_s21 = sadd.s32 4294967295, %s765_s20   ;;  %s820_s22 = sadd.s32 1, %s765_s20   ;;  %s765_s20 = sphi %s805_s20, %s921_s20   ;;  %s761_s19 = sphi %s803_s19, %s920_s19   ;;  %s757_s18 = sphi %s801_s18, %s919_s18  }
   0x3   : > { %s62_s23 = ssub.s32 %s765_s20, %s820_s22  ;;  %s65_s24 = sadd.s32 1, %s761_s19 }
   0x4   : > { %p63_p0 = scmp.eq.s32.totalorder %s62_s23, 0  ;;  %p72_p1 = scmp.ne.s32.totalorder %s761_s19, %s757_s18 }
   0x5   : > { %p73_p2 = scmp.eq.s32.totalorder %s765_s20, 0  ;;  %p123_p3 = scmp.eq.s32.totalorder %s817_s21, 1 }
   0x6   : > { %s830_s25 = scalar_select %p63_p0, %s761_s19, %s65_s24  }
   0x7   : > { %p74_p4 = por %p73_p2, %p72_p1  ;;  %p832_p5 = por %p123_p3, %p72_p1 }
   0x8   : > { %p641_p6 = scmp.ge.s32.totalorder %s765_s20, 2 }
   0xa   : > { %175 = sbr.rel (%p641_p6) target bundleno = 23 (0x17), region = 28 }
   0xf   : > { %178 = sbr.rel (!%p74_p4) target bundleno = 23 (0x17), region = 32  ;;  %s180_s27 = sand.u32 (%p74_p4), 1, %s761_s19  }
  0x10   : > { %s678_s28 = sshll.u32 (%p74_p4), %s765_s20, 3  ;;  %s642_s29 = sshll.u32 (%p74_p4), %s180_s27, 5 }
  0x11   : > { %s185_s7 = scalar_lea.vmem (%p74_p4), %s914_s2, %s678_s28  ;;  %s182_s8 = scalar_lea.vmem (%p74_p4), [#allocation6], %s642_s29 }
  0x12   : > { %v220_v0 = vld [vmem:[%s185_s7] sm:$0xff] (%p74_p4)  ;;  %v222_v1 = vld [vmem:[%s185_s7 + $0x10] sm:$0xff] (%p74_p4) }
  0x13   : > { %v224_v2 = vld [vmem:[%s185_s7 + $0x20] sm:$0xff] (%p74_p4)  ;;  %221 = vst [vmem:[%s182_s8] sm:$0xff] (%p74_p4), %v220_v0  ;;  %v226_v3 = vld [vmem:[%s185_s7 + $0x30] sm:$0xff] (%p74_p4) }
  0x14   : > { %223 = vst [vmem:[%s182_s8 + $0x8] sm:$0xff] %v222_v1 }
  0x15   : > { %225 = vst [vmem:[%s182_s8 + $0x10] sm:$0xff] %v224_v2 }
  0x16   : > { %227 = vst [vmem:[%s182_s8 + $0x18] sm:$0xff] %v226_v3 }
  0x17 PF: > { %p645_p7 = scmp.ge.s32.totalorder %s765_s20, 1  ;;  %p232_p8 = scmp.lt.s32.totalorder %s765_s20, 3 }
  0x19   : > { %p233_p9 = pnand %p645_p7, %p232_p8 }
  0x1a   : > { %s239_s9 = sand.u32 (!%p233_p9), 1, %s757_s18   ;;  %p648_p10 = scmp.ne.s32.totalorder (!%p233_p9), %s817_s21, 0 }
  0x1b   : > { %236 = sbr.rel (%p233_p9) target bundleno = 857 (0x359), region = 70  ;;  %s646_s10 = sshll.u32 (!%p233_p9), %s239_s9, 5 }
  0x1c   : > { %s647_s11 = sshll.u32 (!%p233_p9), %s239_s9, 4  ;;  %s845_s12 = scalar_lea.vmem (!%p233_p9), [#allocation6], %s646_s10 }
  0x1d   : > { %s847_s13 = scalar_lea.vmem (!%p233_p9), [#allocation7], %s647_s11 }
  0x20   : > { %271 = sbr.rel (%p648_p10) target bundleno = 317 (0x13d), region = 78 }
  0x25   : > { %v686_v4 = vld [vmem:[%s912_s0] sm:$0xff]   ;;  %vm277_vm0 = vcmask 261120   ;;  %v767_v9 = vmov 32.0   ;;  %vm339_vm2 = vcmask 7168   ;;  %v768_v29 = vmov -1e+30  }
  0x26   : > { %v687_v5 = vunpack.c.l.bf16 %v686_v4  ;;  %v688_v7 = vunpack.c.h.bf16 %v686_v4  ;;  %718 = vrcp.f32 %v767_v9  ;;  %340 = vst.msk [vmem:[#allocation3] sm:$0xff] %vm339_vm2, %v768_v29  ;;  %v769_v30 = vmov 0.0   ;;  %v717_v42 = vld [vmem:[%s913_s1] ss:$0 sm:$0xff] }
  0x27   : > { %341 = vst.msk [vmem:[#allocation3 + $0x8] sm:$0xff] %vm339_vm2, %v768_v29  ;;  %vm336_vm6 = vcmask 257024  }
  0x28   : > { %v278_v6 = vsel %vm277_vm0, %v687_v5, 0.0  ;;  %v281_v8 = vsel %vm277_vm0, %v688_v7, 0.0  ;;  %342 = vst.msk [vmem:[#allocation4] sm:$0xff] %vm339_vm2, %v769_v30 }
  0x29   : > { %279 = vadd.xlane.f32.xlu0 %v278_v6  ;;  %343 = vst.msk [vmem:[#allocation4 + $0x8] sm:$0xff] %vm339_vm2, %v769_v30 }
  0x2a   : > { %344 = vst.msk [vmem:[#allocation5] sm:$0xff] %vm339_vm2, %v769_v30 }
  0x2b   : > { %345 = vst.msk [vmem:[#allocation5 + $0x8] sm:$0xff] %vm339_vm2, %v769_v30 }
  0x2c   : > { %v719_v10 = vpop.eup %718 }
  0x2d   : > { %v285_v11 = vmul.f32 32.0, %v719_v10  ;;  %vm289_vm1 = vweird.f32 %v719_v10 }
  0x2f   : > { %v286_v12 = vsub.f32 1.0, %v285_v11 }
  0x31   : > { %282 = vadd.xlane.f32.xlu0 %v281_v8  ;;  %v287_v13 = vmul.f32 %v719_v10, %v286_v12 }
  0x33   : > { %v288_v14 = vadd.f32 %v719_v10, %v287_v13 }
  0x35   : > { %v290_v15 = vsel %vm289_vm1, %v719_v10, %v288_v14 }
  0x9c   : > { %v280_v16 = vpop.xlane.xlu0 %279 }
  0x9d   : > { %v291_v17 = vmul.f32 %v290_v15, %v280_v16 }
  0x9f   : > { %v293_v18 = vsub.f32 %v687_v5, %v291_v17 }
  0xa1   : > { %v295_v19 = vmul.f32 %v293_v18, %v293_v18 }
  0xa3   : > { %v297_v20 = vsel %vm277_vm0, %v295_v19, 0.0 }
  0xa4   : > { %298 = vadd.xlane.f32.xlu1 %v297_v20  ;;  %v283_v21 = vpop.xlane.xlu0 %282 }
  0xa5   : > { %v292_v22 = vmul.f32 %v290_v15, %v283_v21 }
  0xa7   : > { %v294_v23 = vsub.f32 %v688_v7, %v292_v22 }
  0xa9   : > { %v296_v24 = vmul.f32 %v294_v23, %v294_v23 }
  0xab   : > { %v300_v25 = vsel %vm277_vm0, %v296_v24, 0.0 }
  0xac   : > { %301 = vadd.xlane.f32.xlu1 %v300_v25 }
 0x117   : > { %v299_v26 = vpop.xlane.xlu1 %298 }
 0x118   : > { %v303_v27 = vmul.f32 %v299_v26, %v290_v15 }
 0x11a   : > { %v305_v28 = vadd.f32 1e-05, %v303_v27 }
 0x11c   : > { %720 = vrsqrt.f32 %v305_v28  ;;  %vm313_vm4 = vweird.f32 %v305_v28 }
 0x11f   : > { %v302_v31 = vpop.xlane.xlu1 %301 }
 0x120   : > { %v304_v32 = vmul.f32 %v302_v31, %v290_v15 }
 0x122   : > { %v721_v33 = vpop.eup %720  ;;  %v306_v34 = vadd.f32 1e-05, %v304_v32 }
 0x123   : > { %v308_v35 = vmul.f32 %v721_v33, %v305_v28  ;;  %vm314_vm3 = vweird.f32 %v721_v33 }
 0x124   : > { %722 = vrsqrt.f32 %v306_v34  ;;  %vm315_vm5 = vmor %vm313_vm4, %vm314_vm3  ;;  %vm323_vm8 = vweird.f32 %v306_v34 }
 0x125   : > { %v309_v36 = vmul.f32 %v721_v33, %v308_v35 }
 0x127   : > { %v310_v37 = vmul.f32 0.5, %v309_v36 }
 0x129   : > { %v311_v38 = vsub.f32 1.5, %v310_v37 }
 0x12a   : > { %v723_v39 = vpop.eup %722 }
 0x12b   : > { %v312_v40 = vmul.f32 %v721_v33, %v311_v38  ;;  %v318_v41 = vmul.f32 %v723_v39, %v306_v34  ;;  %vm324_vm7 = vweird.f32 %v723_v39 }
 0x12c   : > { %vm325_vm9 = vmor %vm323_vm8, %vm324_vm7 }
 0x12d   : > { %v316_v43 = vsel %vm315_vm5, %v721_v33, %v312_v40  ;;  %v319_v44 = vmul.f32 %v723_v39, %v318_v41 }
 0x12e   : > { %v327_v45 = vmul.f32 %v316_v43, %v293_v18 }
 0x12f   : > { %v320_v46 = vmul.f32 0.5, %v319_v44 }
 0x130   : > { %v332_v47 = vmul.f32 %v717_v42, %v327_v45 }
 0x131   : > { %v321_v48 = vsub.f32 1.5, %v320_v46 }
 0x132   : > { %v334_v49 = vpack.c.bf16 %v332_v47, %v332_v47 }
 0x133   : > { %v322_v50 = vmul.f32 %v723_v39, %v321_v48 }
 0x134   : > { %337 = vst.msk [vmem:[#allocation2] sm:$0xf] %vm336_vm6, %v334_v49 }
 0x135   : > { %v326_v51 = vsel %vm325_vm9, %v723_v39, %v322_v50 }
 0x136   : > { %v328_v52 = vmul.f32 %v326_v51, %v294_v23 }
 0x138   : > { %v333_v53 = vmul.f32 %v717_v42, %v328_v52 }
 0x13a   : > { %v335_v54 = vpack.c.bf16 %v333_v53, %v333_v53 }
 0x13c   : > { %338 = vst.msk [vmem:[#allocation2 + $0x4] sm:$0xf] %vm336_vm6, %v335_v54 }
 0x13d PF: > { %v663_v55 = vld [vmem:[%s845_s12 + $0x10] sm:$0xf]  ;;  %v683_v56 = vld [vmem:[%s845_s12 + $0x14] sm:$0xf0]  ;;  %v682_v57 = vld [vmem:[%s845_s12 + $0x14] sm:$0xf]  ;;  %v414_v7 = vlaneseq }
 0x13e   : > { %v664_v58 = vor.u32 %v683_v56, %v663_v55  ;;  %v665_v59 = vld [vmem:[%s845_s12 + $0x18] sm:$0xf0]  ;;  %v655_v60 = vld [vmem:[%s845_s12] sm:$0xf]  ;;  %v681_v61 = vld [vmem:[%s845_s12 + $0x4] sm:$0xf0] }
 0x13f   : > { %v668_v62 = vor.u32 %v682_v57, %v665_v59  ;;  %v680_v63 = vld [vmem:[%s845_s12 + $0x4] sm:$0xf]  ;;  %v657_v0 = vld [vmem:[%s845_s12 + $0x8] sm:$0xf0]  ;;  %v656_v1 = vor.u32 %v681_v61, %v655_v60  ;;  %v770_v4 = vmov 0   ;;  %vm377_vm10 = vcmask 261120  }
 0x140   : > { %387 = vmatpush.bf16.msra.mxu0 %v664_v58  ;;  %v426_v2 = vld [vmem:[%s915_s3] sm:$0xff]  ;;  %v660_v3 = vor.u32 %v680_v63, %v657_v0  ;;  %725 = vset.pattern.permute.xlu2 %v770_v4  ;;  %v427_v6 = vld [vmem:[%s915_s3 + $0x8] sm:$0xff]  ;;  %v415_v8 = vand.u32 127, %v414_v7  ;;  %s671_s27 = sshll.u32 %s817_s21, 8  ;;  %vm452_vm1 = vcmask 7168   ;;  %v456_v37 = vld [vmem:[#allocation3 + $0x8] sm:$0xff] }
 0x141   : > { %401 = vmatpush.bf16.msra.mxu1 %v668_v62  ;;  %431 = vperm.xlu2 %725, %v426_v2   ;;  %v417_v10 = vstv %s671_s27  ;;  %v455_v33 = vld [vmem:[#allocation3] sm:$0xff]  ;;  %v429_v60 = vld [vmem:[#allocation5 + $0x8] sm:$0xff]  ;;  %v465_v2 = vld [vmem:[#allocation4] sm:$0xff]  ;;  %p672_p11 = scmp.ne.s32.totalorder %s817_s21, 1 }
 0x142   : > { %724 = vset.pattern.permute.xlu1 %v770_v4  ;;  %726 = vset.pattern.permute.xlu0 %v770_v4  ;;  %v416_v9 = vadd.s32 128, %v415_v8  ;;  %v418_v12 = vadd.s32 %v417_v10, %v415_v8  ;;  %v428_v41 = vld [vmem:[#allocation5] sm:$0xff]  ;;  %v466_v7 = vld [vmem:[#allocation4 + $0x8] sm:$0xff] }
 0x143   : > { %v679_v5 = vld [vmem:[#allocation2] sm:$0xff] }
 0x144   : > { %388 = vmatpush.bf16.msra.mxu0 %v656_v1  ;;  %v419_v13 = vadd.s32 %v417_v10, %v416_v9  ;;  %vm420_vm11 = vcmp.lt.s32.totalorder %v418_v12, 320 }
 0x145   : > { %402 = vmatpush.bf16.msra.mxu1 %v660_v3 }
 0x146   : > { %vm421_vm12 = vcmp.lt.s32.totalorder %v419_v13, 320 }
 0x147   : > { %669 = vmatmul.msk.bf16.vlgmr.msra.gmra.mxu0 %vm377_vm10, %v679_v5 }
 0x148   : > { %670 = vmatmul.msk.bf16.vlgmr.msra.gmra.mxu1 %vm377_vm10, %v679_v5 }
 0x149   : > { %434 = vperm.xlu2 %725, %v427_v6  }
 0x19b   : > { %v432_v11 = vpop.permute.xlu2 %431 }
 0x19c   : > { %vm436_vm15 = vcmp.eq.s32.totalorder %v418_v12, %v432_v11  ;;  %vm437_vm0 = vcmp.eq.s32.totalorder %v419_v13, %v432_v11 }
 0x1a3   : > { %v435_v20 = vpop.permute.xlu2 %434 }
 0x1a4   : > { %vm438_vm13 = vcmp.eq.s32.totalorder %v418_v12, %v435_v20  ;;  %vm439_vm14 = vcmp.eq.s32.totalorder %v419_v13, %v435_v20 }
 0x1c4   : > { %v390_v14 = vpop.f32.mrf.mxu0 }
 0x1c5   : > { %v404_v15 = vpop.f32.mrf.mxu1  ;;  %v422_v16 = vsel %vm420_vm11, %v390_v14, -1e+30  ;;  %v440_v30 = vsel %vm436_vm15, %v390_v14, 0.0 }
 0x1c6   : > { %v409_v17 = vpack.c.bf16 %v404_v15, %v390_v14  ;;  %v423_v18 = vsel %vm421_vm12, %v404_v15, -1e+30  ;;  %v441_v31 = vsel %vm437_vm0, %v404_v15, 0.0 }
 0x1c7   : > { %v457_v19 = vmax.f32 %v422_v16, %v423_v18  ;;  %v444_v32 = vadd.f32 %v441_v31, %v440_v30 }
 0x1c8   : > { %411 = vst [vmem:[%s847_s13] sm:$0xff] %v409_v17 }
 0x1c9   : > { %458 = vmax.xlane.f32.xlu0 %v457_v19 }
 0x1cc   : > { %v392_v21 = vpop.f32.mrf.mxu0 }
 0x1cd   : > { %v424_v22 = vsel %vm420_vm11, %v392_v21, -1e+30  ;;  %v442_v23 = vsel %vm438_vm13, %v392_v21, 0.0  ;;  %v406_v24 = vpop.f32.mrf.mxu1 }
 0x1ce   : > { %v410_v25 = vpack.c.bf16 %v406_v24, %v392_v21  ;;  %v425_v26 = vsel %vm421_vm12, %v406_v24, -1e+30  ;;  %v443_v27 = vsel %vm439_vm14, %v406_v24, 0.0 }
 0x1cf   : > { %v460_v28 = vmax.f32 %v424_v22, %v425_v26  ;;  %v447_v29 = vadd.f32 %v443_v27, %v442_v23 }
 0x1d0   : > { %412 = vst [vmem:[%s847_s13 + $0x8] sm:$0xff] %v410_v25 }
 0x1d1   : > { %461 = vmax.xlane.f32.xlu0 %v460_v28 }
 0x1d9   : > { %445 = vadd.xlane.f32.xlu0 %v444_v32 }
 0x23c   : > { %v459_v34 = vpop.xlane.xlu0 %458 }
 0x23d   : > { %v463_v35 = vmax.f32 %v455_v33, %v459_v34 }
 0x23f   : > { %v467_v36 = vsub.f32 %v455_v33, %v463_v35  ;;  %507 = vst.msk [vmem:[#allocation3] sm:$0xff] %vm452_vm1, %v463_v35  ;;  %477 = vperm.xlu1 %724, %v463_v35  }
 0x241   : > { %v469_v63 = vmul.f32 1.442695, %v467_v36 }
 0x244   : > { %v462_v38 = vpop.xlane.xlu0 %461 }
 0x245   : > { %v464_v39 = vmax.f32 %v456_v37, %v462_v38 }
 0x247   : > { %v468_v40 = vsub.f32 %v456_v37, %v464_v39  ;;  %508 = vst.msk [vmem:[#allocation3 + $0x8] sm:$0xff] %vm452_vm1, %v464_v39  ;;  %482 = vperm.xlu1 %724, %v464_v39  }
 0x249   : > { %v471_v0 = vmul.f32 1.442695, %v468_v40 }
 0x24c   : > { %v446_v42 = vpop.xlane.xlu0 %445 }
 0x24d   : > { %v450_v43 = vadd.f32 %v446_v42, %v428_v41 }
 0x24f   : > { %453 = vst.msk [vmem:[#allocation5] sm:$0xff] %vm452_vm1, %v450_v43 }
 0x271   : > { %448 = vadd.xlane.f32.xlu1 %v447_v29 }
 0x2b1   : > { %v478_v44 = vpop.permute.xlu1 %477 }
 0x2b2   : > { %v485_v45 = vsub.f32 %v422_v16, %v478_v44  ;;  %v486_v46 = vsub.f32 %v423_v18, %v478_v44 }
 0x2b4   : > { %v489_v47 = vmul.f32 1.442695, %v485_v45  ;;  %v491_v48 = vmul.f32 1.442695, %v486_v46 }
 0x2b6   : > { %727 = vpow2.f32 %v489_v47 }
 0x2b7   : > { %729 = vpow2.f32 %v491_v48 }
 0x2b9   : > { %v483_v49 = vpop.permute.xlu1 %482 }
 0x2ba   : > { %v487_v50 = vsub.f32 %v424_v22, %v483_v49  ;;  %v488_v51 = vsub.f32 %v425_v26, %v483_v49 }
 0x2bc   : > { %v728_v52 = vpop.eup %727  ;;  %v493_v53 = vmul.f32 1.442695, %v487_v50  ;;  %v495_v54 = vmul.f32 1.442695, %v488_v51 }
 0x2bd   : > { %v730_v55 = vpop.eup %729 }
 0x2be   : > { %731 = vpow2.f32 %v493_v53  ;;  %v497_v56 = vadd.f32 %v730_v55, %v728_v52 }
 0x2bf   : > { %733 = vpow2.f32 %v495_v54 }
 0x2c0   : > { %498 = vadd.xlane.f32.xlu2 %v497_v56  ;;  %735 = vpow2.f32 %v469_v63 }
 0x2c1   : > { %737 = vpow2.f32 %v471_v0 }
 0x2c4   : > { %v732_v57 = vpop.eup %731 }
 0x2c5   : > { %v734_v58 = vpop.eup %733 }
 0x2c6   : > { %v500_v59 = vadd.f32 %v734_v58, %v732_v57  ;;  %v736_v1 = vpop.eup %735 }
 0x2c7   : > { %v473_v3 = vmul.f32 %v736_v1, %v465_v2  ;;  %v738_v6 = vpop.eup %737 }
 0x2c8   : > { %501 = vadd.xlane.f32.xlu0 %v500_v59  ;;  %v474_v8 = vmul.f32 %v738_v6, %v466_v7 }
 0x2e4   : > { %v449_v61 = vpop.xlane.xlu1 %448 }
 0x2e5   : > { %v451_v62 = vadd.f32 %v449_v61, %v429_v60 }
 0x2e7   : > { %454 = vst.msk [vmem:[#allocation5 + $0x8] sm:$0xff] %vm452_vm1, %v451_v62 }
 0x333   : > { %v499_v4 = vpop.xlane.xlu2 %498 }
 0x334   : > { %v503_v5 = vadd.f32 %v499_v4, %v473_v3 }
 0x336   : > { %505 = vst.msk [vmem:[#allocation4] sm:$0xff] %vm452_vm1, %v503_v5 }
 0x33a   : > { %512 = sbr.rel (%p672_p11) target bundleno = 852 (0x354), region = 82 }
 0x33b   : > { %v502_v9 = vpop.xlane.xlu0 %501 }
 0x33c   : > { %v504_v10 = vadd.f32 %v502_v9, %v474_v8 }
 0x33e   : > { %506 = vst.msk [vmem:[#allocation4 + $0x8] sm:$0xff] %vm452_vm1, %v504_v10 }
 0x33f   : > { %v515_v11 = vld [vmem:[#allocation4] sm:$0xff]  ;;  %v513_v14 = vld [vmem:[#allocation3] sm:$0xff]  ;;  %v514_v17 = vld [vmem:[#allocation3 + $0x8] sm:$0xff] }
 0x340   : > { %739 = vlog2.f32 %v515_v11  ;;  %v523_v18 = vld [vmem:[#allocation5] sm:$0xff]  ;;  %v524_v21 = vld [vmem:[#allocation5 + $0x8] sm:$0xff] }
 0x345   : > { %v516_v12 = vld [vmem:[#allocation4 + $0x8] sm:$0xff] }
 0x346   : > { %741 = vlog2.f32 %v516_v12  ;;  %v740_v13 = vpop.eup %739 }
 0x347   : > { %v518_v16 = vmul.f32 0.6931472, %v740_v13 }
 0x349   : > { %v521_v20 = vadd.f32 %v518_v16, %v513_v14 }
 0x34b   : > { %v525_v23 = vsub.f32 %v521_v20, %v523_v18 }
 0x34c   : > { %v742_v15 = vpop.eup %741 }
 0x34d   : > { %v520_v19 = vmul.f32 0.6931472, %v742_v15  ;;  %527 = vst.msk [vmem:[%s917_s5] sm:$0xff] %vm452_vm1, %v525_v23 }
 0x34f   : > { %v522_v22 = vadd.f32 %v520_v19, %v514_v17 }
 0x351   : > { %v526_v24 = vsub.f32 %v522_v22, %v524_v21 }
 0x353   : > { %528 = vst.msk [vmem:[%s917_s5 + $0x8] sm:$0xff] %vm452_vm1, %v526_v24 }
 0x354 PF: > { %535 = sbr.rel (!%p832_p5) target bundleno = 857 (0x359), region = 86  ;;  %s684_s7 = sshll.u32 (%p832_p5), %s817_s21, 3  ;;  %v569_v25 = vld [vmem:[%s847_s13] sm:$0xff] (%p832_p5)  ;;  %v571_v26 = vld [vmem:[%s847_s13 + $0x8] sm:$0xff] (%p832_p5) }
 0x355   : > { %s538_s10 = scalar_lea.vmem (%p832_p5), %s916_s4, %s684_s7 }
 0x356   : > { %570 = vst [vmem:[%s538_s10] sm:$0xff] (%p832_p5), %v569_v25 }
 0x357   : > { %572 = vst [vmem:[%s538_s10 + $0x10] sm:$0xff] (%p832_p5), %v571_v26 }
 0x359 PF: > { %p13_p12 = scmp.ge.s32.totalorder %s820_s22, 4   ;;  %s919_s18 = smov %s761_s19 }
 0x35a   : > { %s920_s19 = smov %s830_s25  ;;  %s921_s20 = smov %s820_s22 }
 0x35b   :  { %15 = sbr.rel (!%p13_p12) target bundleno = 2 (0x2), region = 163 }

// kernel: toygpt_forward.3
= control target key start
LH: loop header
LB: loop body
LE: loop exit
PB: predicated region body
PF: predicated region fallthrough
CT: control target
= control target key end

     0   :  { %s1188_s17 = smov 0   ;;  %s1340_s0 = inlined_call_operand.vmem [shape: bf16[2,8,32], index: 0, kind: input, shape index: {}]   ;;  %s1341_s1 = inlined_call_operand.vmem [shape: f32[1,32], index: 1, kind: input, shape index: {}]   ;;  %s1342_s2 = inlined_call_operand.vmem [shape: f32[1,32], index: 2, kind: input, shape index: {}]   ;;  %s1343_s3 = inlined_call_operand.vmem [shape: bf16[32,96], index: 3, kind: input, shape index: {}]   ;;  %s1344_s4 = inlined_call_operand.vmem [shape: bf16[32,32], index: 4, kind: input, shape index: {}]   ;;  %s1345_s5 = inlined_call_operand.vmem [shape: f32[1,32], index: 5, kind: input, shape index: {}]   ;;  %s1346_s6 = inlined_call_operand.vmem [shape: f32[1,32], index: 6, kind: input, shape index: {}]   ;;  %s1347_s7 = inlined_call_operand.vmem [shape: bf16[32,128], index: 7, kind: input, shape index: {}]   ;;  %s1348_s8 = inlined_call_operand.vmem [shape: f32[1,128], index: 8, kind: input, shape index: {}]   ;;  %s1349_s9 = inlined_call_operand.vmem [shape: bf16[128,32], index: 9, kind: input, shape index: {}]   ;;  %s1350_s10 = inlined_call_operand.vmem [shape: f32[1,32], index: 10, kind: input, shape index: {}]   ;;  %s1351_s11 = inlined_call_operand.vmem [shape: bf16[2,8,32], index: 11, kind: output, shape index: {}]  }
   0x1 LB: > { %s974_s18 = sadd.s32 4294967295, %s1117_s17   ;;  %p978_p0 = scmp.ge.s32.totalorder %s1117_s17, 1  ;;  %s1117_s17 = sphi %s1188_s17, %s21_s17  }
   0x2   : > { %p336_p1 = scmp.lt.s32.totalorder %s1117_s17, 3 }
   0x4   : > { %p337_p2 = pnand %p978_p0, %p336_p1 }
   0x5   : > { %p374_p3 = scmp.lt.s32.totalorder (!%p337_p2), %s974_s18, 1  ;;  %s1120_s12 = smov (!%p337_p2), 104  }
   0x6   : > { %340 = sbr.rel (%p337_p2) target bundleno = 1984 (0x7c0), region = 64  ;;  %s1121_s13 = smov (!%p337_p2), 120  }
   0x7   : > { %s1122_s14 = smov (!%p337_p2), 112   ;;  %s1123_s15 = smov (!%p337_p2), 96  }
   0x8   : > { %s1124_s16 = smov (!%p337_p2), 64   ;;  %s1125_s20 = smov (!%p337_p2), 8  }
   0x9   : > { %s1126_s21 = smov (!%p337_p2), 24  }
   0xb   : > { %s1353_s18 = smov (!%p374_p3, %s974_s18), 1  ;;  %vm387_vm0 = vcmask 261120   ;;  %v1119_v3 = vmov 32.0   ;;  %v1051_v15 = vld [vmem:[%s1343_s3 + $0x8] sm:$0xff]  ;;  %v1050_v16 = vld [vmem:[%s1343_s3] sm:$0xff]  ;;  %vm470_vm5 = vcmask 64512   ;;  %v563_v55 = vlaneseq }
   0xc   : > { %s979_s19 = sshll.u32 %s1353_s18, 2  ;;  %1087 = vrcp.f32 %v1119_v3  ;;  %451 = vmatpush.bf16.msra.mxu0 %v1051_v15  ;;  %v1081_v26 = vld [vmem:[%s1341_s1] ss:$0 sm:$0xff]  ;;  %vm627_vm7 = vcmask 1043456   ;;  %vm720_vm8 = vcmask 130048   ;;  %vm722_vm9 = vcmask 195584  }
   0xd   : > { %s377_s22 = scalar_lea.vmem %s1340_s0, %s979_s19  ;;  %v1082_v29 = vld [vmem:[%s1342_s2] ss:$0 sm:$0xff]  ;;  %v564_v56 = vshrl.u32 %v563_v55, 7  ;;  %v566_v57 = vand.u32 127, %v563_v55  ;;  %s381_s25 = scalar_lea.vmem %s1351_s11, %s979_s19  ;;  %vm919_vm13 = vcmask 257024  }
   0xe   : > { %v383_v0 = vld [vmem:[%s377_s22] sm:$0xf]  ;;  %s1127_s22 = smov 16  }
   0xf   : > { %v1204_v1 = vunpack.c.l.bf16 %v383_v0  ;;  %vm567_vm6 = vcmp.ge.s32.totalorder %v564_v56, %v566_v57 }
  0x10   : > { %452 = vmatpush.bf16.msra.mxu0 %v1050_v16 }
  0x11   : > { %v388_v2 = vsel %vm387_vm0, %v1204_v1, 0.0 }
  0x12   : > { %389 = vadd.xlane.f32.xlu0 %v388_v2  ;;  %v1088_v4 = vpop.eup %1087 }
  0x13   : > { %v392_v5 = vmul.f32 32.0, %v1088_v4  ;;  %vm396_vm1 = vweird.f32 %v1088_v4 }
  0x15   : > { %v393_v6 = vsub.f32 1.0, %v392_v5 }
  0x17   : > { %v394_v7 = vmul.f32 %v1088_v4, %v393_v6 }
  0x19   : > { %v395_v8 = vadd.f32 %v1088_v4, %v394_v7 }
  0x1b   : > { %v1208_v9 = vsel %vm396_vm1, %v1088_v4, %v395_v8 }
  0x85   : > { %v390_v10 = vpop.xlane.xlu0 %389 }
  0x86   : > { %v398_v11 = vmul.f32 %v1208_v9, %v390_v10 }
  0x88   : > { %v399_v12 = vsub.f32 %v1204_v1, %v398_v11 }
  0x8a   : > { %v400_v13 = vmul.f32 %v399_v12, %v399_v12 }
  0x8c   : > { %v401_v14 = vsel %vm387_vm0, %v400_v13, 0.0 }
  0x8d   : > { %402 = vadd.xlane.f32.xlu0 %v401_v14 }
 0x100   : > { %v403_v17 = vpop.xlane.xlu0 %402 }
 0x101   : > { %v404_v18 = vmul.f32 %v403_v17, %v1208_v9 }
 0x103   : > { %v405_v19 = vadd.f32 1e-05, %v404_v18 }
 0x105   : > { %1089 = vrsqrt.f32 %v405_v19  ;;  %vm412_vm3 = vweird.f32 %v405_v19 }
 0x10b   : > { %v1090_v20 = vpop.eup %1089 }
 0x10c   : > { %v407_v21 = vmul.f32 %v1090_v20, %v405_v19  ;;  %vm413_vm2 = vweird.f32 %v1090_v20 }
 0x10d   : > { %vm414_vm4 = vmor %vm412_vm3, %vm413_vm2 }
 0x10e   : > { %v408_v22 = vmul.f32 %v1090_v20, %v407_v21 }
 0x110   : > { %v409_v23 = vmul.f32 0.5, %v408_v22 }
 0x112   : > { %v410_v24 = vsub.f32 1.5, %v409_v23 }
 0x114   : > { %v411_v25 = vmul.f32 %v1090_v20, %v410_v24 }
 0x116   : > { %v415_v27 = vsel %vm414_vm4, %v1090_v20, %v411_v25 }
 0x117   : > { %v416_v28 = vmul.f32 %v415_v27, %v399_v12 }
 0x119   : > { %v420_v30 = vmul.f32 %v1081_v26, %v416_v28 }
 0x11b   : > { %v424_v31 = vadd.f32 %v1082_v29, %v420_v30 }
 0x11d   : > { %v425_v32 = vpack.c.bf16 %v424_v31, %v424_v31 }
 0x11f   : > { %989 = vmatmul.msk.bf16.vlgmr.msra.gmra.mxu0 %vm387_vm0, %v425_v32 }
 0x19c   : > { %v454_v33 = vpop.f32.mrf.mxu0 }
 0x19d   : > { %v458_v34 = vpack.c.bf16 %v454_v33, %v454_v33 }
 0x19f   : > { %464 = vrot.lane.b32.xlu2 %v458_v34, %s1120_s12  ;;  %460 = vrot.lane.b32.xlu1 %v458_v34, %s1121_s13  ;;  %v466_v42 = vunpack.c.l.b16 %v458_v34 }
 0x1a1   : > { %v1232_v46 = vpack.c.b16 %v466_v42, %v466_v42 }
 0x1a4   : > { %v456_v35 = vpop.f32.mrf.mxu0 }
 0x1a7   : > { %462 = vrot.lane.b32.xlu1 %v458_v34, %s1122_s14 }
 0x1f9   : > { %v465_v36 = vpop.permute.xlu2 %464 }
 0x1fa   : > { %v536_v37 = vunpack.c.l.b16 %v465_v36 }
 0x1fc   : > { %v1227_v38 = vpack.c.b16 %v536_v37, %v536_v37 }
 0x1fe   : > { %538 = vrot.lane.b32.xlu1 %v1227_v38, %s1123_s15 }
 0x211   : > { %v461_v39 = vpop.permute.xlu1 %460 }
 0x212   : > { %v490_v40 = vunpack.c.l.b16 %v461_v39 }
 0x214   : > { %v491_v41 = vpack.c.b16 %v490_v40, %v490_v40 }
 0x216   : > { %492 = vrot.lane.b32.xlu2 %v491_v41, %s1123_s15 }
 0x219   : > { %v463_v43 = vpop.permute.xlu1 %462 }
 0x21a   : > { %v513_v44 = vunpack.c.l.b16 %v463_v43 }
 0x21c   : > { %v1230_v45 = vpack.c.b16 %v513_v44, %v513_v44 }
 0x21e   : > { %515 = vrot.lane.b32.xlu0 %v1230_v45, %s1123_s15  ;;  %468 = vrot.lane.b32.xlu2 %v1232_v46, %s1123_s15 }
 0x270   : > { %v493_v47 = vpop.permute.xlu2 %492  ;;  %v539_v48 = vpop.permute.xlu1 %538 }
 0x271   : > { %v498_v49 = vsel %vm470_vm5, %v493_v47, 0  ;;  %v544_v50 = vsel %vm470_vm5, %v539_v48, 0 }
 0x272   : > { %507 = vmatpush.bf16.xpose.msra.mxu2 %v498_v49  ;;  %553 = vmatpush.bf16.xpose.msrb.mxu0 %v544_v50 }
 0x278   : > { %v469_v51 = vpop.permute.xlu2 %468 }
 0x279   : > { %991 = vmatmul.msk.bf16.vlgmr.msra.gmra.mxu2 %vm470_vm5, %v461_v39  ;;  %993 = vmatmul.msk.bf16.vlgmr.msrb.gmra.mxu0 %vm470_vm5, %v465_v36  ;;  %v475_v52 = vsel %vm470_vm5, %v469_v51, 0 }
 0x27a   : > { %484 = vmatpush.bf16.xpose.msra.mxu1 %v475_v52 }
 0x281   : > { %990 = vmatmul.msk.bf16.vlgmr.msra.gmra.mxu1 %vm470_vm5, %v458_v34 }
 0x290   : > { %v516_v53 = vpop.permute.xlu0 %515 }
 0x291   : > { %v521_v54 = vsel %vm470_vm5, %v516_v53, 0 }
 0x292   : > { %530 = vmatpush.bf16.xpose.msra.mxu3 %v521_v54 }
 0x299   : > { %992 = vmatmul.msk.bf16.vlgmr.msra.gmra.mxu3 %vm470_vm5, %v463_v43 }
 0x2f6   : > { %v555_v58 = vpop.f32.mrf.mxu0 }
 0x2f7   : > { %v562_v59 = vmul.f32 0.35355338, %v555_v58 }
 0x2f9   : > { %v573_v60 = vsel %vm567_vm6, %v562_v59, -1e+30 }
 0x2fa   : > { %v583_v61 = vsel %vm470_vm5, %v573_v60, -inf }
 0x2fb   : > { %584 = vmax.xlane.f32.xlu0 %v583_v61 }
 0x2fc   : > { %v509_v62 = vpop.f32.mrf.mxu2 }
 0x2fd   : > { %v560_v63 = vmul.f32 0.35355338, %v509_v62 }
 0x2fe   : > { %v486_v0 = vpop.f32.mrf.mxu1  ;;  %v557_v2 = vpop.f32.mrf.mxu0 }
 0x2ff   : > { %v571_v3 = vsel %vm567_vm6, %v560_v63, -1e+30  ;;  %v559_v12 = vmul.f32 0.35355338, %v486_v0 }
 0x300   : > { %v577_v4 = vsel %vm470_vm5, %v571_v3, -inf }
 0x301   : > { %578 = vmax.xlane.f32.xlu1 %v577_v4  ;;  %v570_v14 = vsel %vm567_vm6, %v559_v12, -1e+30 }
 0x302   : > { %v574_v15 = vsel %vm470_vm5, %v570_v14, -inf }
 0x304   : > { %v511_v5 = vpop.f32.mrf.mxu2 }
 0x305   : > { %v1053_v5 = vld [vmem:[%s1344_s4 + $0x8] sm:$0xff] }
 0x306   : > { %v488_v6 = vpop.f32.mrf.mxu1 }
 0x307   : > { %v1052_v6 = vld [vmem:[%s1344_s4] sm:$0xff] }
 0x30f   : > { %644 = vrot.lane.b32.xlu0 %v491_v41, %s1124_s16 }
 0x31c   : > { %v532_v7 = vpop.f32.mrf.mxu3 }
 0x31d   : > { %v561_v8 = vmul.f32 0.35355338, %v532_v7 }
 0x31f   : > { %v572_v10 = vsel %vm567_vm6, %v561_v8, -1e+30 }
 0x320   : > { %v580_v11 = vsel %vm470_vm5, %v572_v10, -inf }
 0x321   : > { %581 = vmax.xlane.f32.xlu2 %v580_v11 }
 0x324   : > { %v534_v13 = vpop.f32.mrf.mxu3 }
 0x329   : > { %575 = vmax.xlane.f32.xlu2 %v574_v15 }
 0x36e   : > { %v585_v16 = vpop.xlane.xlu0 %584 }
 0x36f   : > { %v589_v17 = vsub.f32 %v573_v60, %v585_v16 }
 0x371   : > { %v596_v18 = vmul.f32 1.442695, %v589_v17 }
 0x373   : > { %1091 = vpow2.f32 %v596_v18 }
 0x374   : > { %v579_v19 = vpop.xlane.xlu1 %578 }
 0x375   : > { %v587_v20 = vsub.f32 %v571_v3, %v579_v19 }
 0x377   : > { %v592_v21 = vmul.f32 1.442695, %v587_v20 }
 0x379   : > { %v1092_v22 = vpop.eup %1091  ;;  %1093 = vpow2.f32 %v592_v21 }
 0x37a   : > { %v607_v23 = vsel %vm470_vm5, %v1092_v22, 0.0 }
 0x37b   : > { %608 = vadd.xlane.f32.xlu1 %v607_v23 }
 0x37f   : > { %v1094_v24 = vpop.eup %1093 }
 0x380   : > { %v601_v26 = vsel %vm470_vm5, %v1094_v24, 0.0 }
 0x381   : > { %v645_v25 = vpop.permute.xlu0 %644 }
 0x382   : > { %v650_v27 = vsel %vm627_vm7, %v645_v25, 0  ;;  %v1063_v25 = vld [vmem:[%s1349_s9 + $0x38] sm:$0xff] }
 0x383   : > { %602 = vadd.xlane.f32.xlu1 %v601_v26  ;;  %659 = vmatpush.bf16.msrb.mxu2 %v650_v27 }
 0x394   : > { %v582_v28 = vpop.xlane.xlu2 %581 }
 0x395   : > { %v588_v29 = vsub.f32 %v572_v10, %v582_v28 }
 0x397   : > { %v594_v30 = vmul.f32 1.442695, %v588_v29 }
 0x399   : > { %1095 = vpow2.f32 %v594_v30 }
 0x39c   : > { %v576_v31 = vpop.xlane.xlu2 %575  ;;  %686 = vrot.lane.b32.xlu1 %v1227_v38, %s1124_s16 }
 0x39d   : > { %v586_v32 = vsub.f32 %v570_v14, %v576_v31 }
 0x39f   : > { %v1096_v33 = vpop.eup %1095  ;;  %v590_v34 = vmul.f32 1.442695, %v586_v32 }
 0x3a0   : > { %v604_v35 = vsel %vm470_vm5, %v1096_v33, 0.0 }
 0x3a1   : > { %1097 = vpow2.f32 %v590_v34  ;;  %605 = vadd.xlane.f32.xlu2 %v604_v35  ;;  %v1083_v35 = vld [vmem:[%s1345_s5] ss:$0 sm:$0xff] }
 0x3a7   : > { %v1098_v36 = vpop.eup %1097 }
 0x3a8   : > { %v598_v37 = vsel %vm470_vm5, %v1098_v36, 0.0 }
 0x3a9   : > { %599 = vadd.xlane.f32.xlu0 %v598_v37 }
 0x3b9   : > { %665 = vrot.lane.b32.xlu2 %v1230_v45, %s1124_s16 }
 0x3c1   : > { %622 = vrot.lane.b32.xlu2 %v1232_v46, %s1124_s16 }
 0x3ee   : > { %v609_v39 = vpop.xlane.xlu1 %608 }
 0x3f6   : > { %v603_v40 = vpop.xlane.xlu1 %602 }
 0x3f7   : > { %1099 = vrcp.f32 %v603_v40 }
 0x3f8   : > { %1101 = vrcp.f32 %v609_v39 }
 0x3fd   : > { %v1100_v38 = vpop.eup %1099 }
 0x3fe   : > { %v615_v41 = vmul.f32 %v1100_v38, %v1094_v24  ;;  %v1102_v43 = vpop.eup %1101  ;;  %v1055_v24 = vld [vmem:[%s1347_s7 + $0x8] sm:$0xff] }
 0x3ff   : > { %v617_v44 = vmul.f32 %v1102_v43, %v1092_v22  ;;  %819 = vmatpush.bf16.msra.mxu2 %v1055_v24  ;;  %v1060_v43 = vld [vmem:[%s1349_s9 + $0x20] sm:$0xff] }
 0x400   : > { %v619_v42 = vpack.c.bf16 %v615_v41, %v615_v41  ;;  %v1062_v41 = vld [vmem:[%s1349_s9 + $0x30] sm:$0xff] }
 0x401   : > { %v621_v49 = vpack.c.bf16 %v617_v44, %v617_v44  ;;  %v1059_v44 = vld [vmem:[%s1349_s9 + $0x18] sm:$0xff] }
 0x402   : > { %995 = vmatmul.msk.bf16.vlgmr.msrb.gmra.mxu2 %vm470_vm5, %v619_v42  ;;  %v1061_v42 = vld [vmem:[%s1349_s9 + $0x28] sm:$0xff] }
 0x40e   : > { %v687_v47 = vpop.permute.xlu1 %686 }
 0x40f   : > { %v692_v48 = vsel %vm627_vm7, %v687_v47, 0  ;;  %v1058_v47 = vld [vmem:[%s1349_s9 + $0x10] sm:$0xff] }
 0x410   : > { %701 = vmatpush.bf16.msra.mxu0 %v692_v48  ;;  %v1057_v48 = vld [vmem:[%s1349_s9 + $0x8] sm:$0xff] }
 0x413   : > { %997 = vmatmul.msk.bf16.vlgmr.msra.gmra.mxu0 %vm470_vm5, %v621_v49  ;;  %v1056_v49 = vld [vmem:[%s1349_s9] sm:$0xff] }
 0x414   : > { %v606_v45 = vpop.xlane.xlu2 %605 }
 0x415   : > { %1103 = vrcp.f32 %v606_v45  ;;  %v1085_v45 = vld [vmem:[%s1348_s8] ss:$0 sm:$0xff] }
 0x41b   : > { %v1104_v46 = vpop.eup %1103 }
 0x41c   : > { %v616_v50 = vmul.f32 %v1104_v46, %v1096_v33  ;;  %v666_v51 = vpop.permute.xlu2 %665  ;;  %v600_v52 = vpop.xlane.xlu0 %599 }
 0x41d   : > { %1105 = vrcp.f32 %v600_v52  ;;  %v671_v53 = vsel %vm627_vm7, %v666_v51, 0 }
 0x41e   : > { %680 = vmatpush.bf16.msrb.mxu3 %v671_v53  ;;  %v620_v54 = vpack.c.bf16 %v616_v50, %v616_v50 }
 0x421   : > { %996 = vmatmul.msk.bf16.vlgmr.msrb.gmra.mxu3 %vm470_vm5, %v620_v54 }
 0x422   : > { %904 = vmatpush.bf16.msra.mxu3 %v1063_v25 }
 0x423   : > { %v1106_v55 = vpop.eup %1105 }
 0x424   : > { %v614_v56 = vmul.f32 %v1106_v55, %v1098_v36  ;;  %v623_v57 = vpop.permute.xlu2 %622 }
 0x425   : > { %v629_v58 = vsel %vm627_vm7, %v623_v57, 0 }
 0x426   : > { %v618_v59 = vpack.c.bf16 %v614_v56, %v614_v56  ;;  %638 = vmatpush.bf16.msrb.mxu1 %v629_v58  ;;  %905 = vmatpush.bf16.msra.mxu3 %v1062_v41 }
 0x429   : > { %994 = vmatmul.msk.bf16.vlgmr.msrb.gmra.mxu1 %vm470_vm5, %v618_v59 }
 0x42a   : > { %750 = vmatpush.bf16.msra.mxu1 %v1053_v5  ;;  %906 = vmatpush.bf16.msra.mxu3 %v1061_v42 }
 0x42e   : > { %751 = vmatpush.bf16.msra.mxu1 %v1052_v6  ;;  %907 = vmatpush.bf16.msra.mxu3 %v1060_v43 }
 0x432   : > { %908 = vmatpush.bf16.msra.mxu3 %v1059_v44 }
 0x436   : > { %909 = vmatpush.bf16.msra.mxu3 %v1058_v47 }
 0x43a   : > { %910 = vmatpush.bf16.msra.mxu3 %v1057_v48 }
 0x43e   : > { %911 = vmatpush.bf16.msra.mxu3 %v1056_v49 }
 0x485   : > { %v661_v60 = vpop.f32.mrf.mxu2 }
 0x486   : > { %708 = vrot.lane.b32.xlu1 %v661_v60, %s1125_s20 }
 0x48d   : > { %v663_v61 = vpop.f32.mrf.mxu2 }
 0x490   : > { %v703_v62 = vpop.f32.mrf.mxu0 }
 0x491   : > { %716 = vrot.lane.b32.xlu1 %v703_v62, %s1126_s21  ;;  %v1086_v62 = vld [vmem:[%s1350_s10] ss:$0 sm:$0xff] }
 0x498   : > { %v705_v63 = vpop.f32.mrf.mxu0 }
 0x4a4   : > { %v682_v0 = vpop.f32.mrf.mxu3 }
 0x4a5   : > { %712 = vrot.lane.b32.xlu2 %v682_v0, %s1127_s22 }
 0x4a6   : > { %v640_v2 = vpop.f32.mrf.mxu1 }
 0x4ac   : > { %v684_v3 = vpop.f32.mrf.mxu3 }
 0x4ae   : > { %v642_v4 = vpop.f32.mrf.mxu1 }
 0x4f8   : > { %v709_v7 = vpop.permute.xlu1 %708 }
 0x4f9   : > { %v719_v10 = vsel %vm470_vm5, %v640_v2, %v709_v7 }
 0x4ff   : > { %v713_v8 = vpop.permute.xlu2 %712 }
 0x500   : > { %v721_v11 = vsel %vm720_vm8, %v719_v10, %v713_v8 }
 0x503   : > { %v717_v12 = vpop.permute.xlu1 %716 }
 0x504   : > { %v723_v13 = vsel %vm722_vm9, %v721_v11, %v717_v12 }
 0x505   : > { %v724_v14 = vpack.c.bf16 %v723_v13, %v723_v13 }
 0x507   : > { %1006 = vmatmul.msk.bf16.vlgmr.msra.gmra.mxu1 %vm387_vm0, %v724_v14 }
 0x584   : > { %v753_v15 = vpop.f32.mrf.mxu1 }
 0x585   : > { %v1280_v16 = vadd.f32 %v753_v15, %v1204_v1  ;;  %v1054_v1 = vld [vmem:[%s1347_s7] sm:$0xff] }
 0x586   : > { %820 = vmatpush.bf16.msra.mxu2 %v1054_v1 }
 0x587   : > { %v759_v17 = vsel %vm387_vm0, %v1280_v16, 0.0 }
 0x588   : > { %760 = vadd.xlane.f32.xlu2 %v759_v17 }
 0x58c   : > { %v755_v18 = vpop.f32.mrf.mxu1 }
 0x5fb   : > { %v761_v19 = vpop.xlane.xlu2 %760 }
 0x5fc   : > { %v762_v20 = vmul.f32 %v761_v19, %v1208_v9 }
 0x5fe   : > { %v763_v21 = vsub.f32 %v1280_v16, %v762_v20 }
 0x600   : > { %v764_v22 = vmul.f32 %v763_v21, %v763_v21 }
 0x602   : > { %v765_v23 = vsel %vm387_vm0, %v764_v22, 0.0 }
 0x603   : > { %766 = vadd.xlane.f32.xlu1 %v765_v23 }
 0x676   : > { %v767_v26 = vpop.xlane.xlu1 %766 }
 0x677   : > { %v768_v27 = vmul.f32 %v767_v26, %v1208_v9  ;;  %v1084_v9 = vld [vmem:[%s1346_s6] ss:$0 sm:$0xff] }
 0x679   : > { %v769_v28 = vadd.f32 1e-05, %v768_v27 }
 0x67b   : > { %1107 = vrsqrt.f32 %v769_v28  ;;  %vm776_vm11 = vweird.f32 %v769_v28 }
 0x681   : > { %v1108_v29 = vpop.eup %1107 }
 0x682   : > { %v771_v30 = vmul.f32 %v1108_v29, %v769_v28  ;;  %vm777_vm10 = vweird.f32 %v1108_v29 }
 0x683   : > { %vm778_vm12 = vmor %vm776_vm11, %vm777_vm10 }
 0x684   : > { %v772_v31 = vmul.f32 %v1108_v29, %v771_v30 }
 0x686   : > { %v773_v32 = vmul.f32 0.5, %v772_v31 }
 0x688   : > { %v774_v33 = vsub.f32 1.5, %v773_v32 }
 0x68a   : > { %v775_v34 = vmul.f32 %v1108_v29, %v774_v33 }
 0x68c   : > { %v779_v36 = vsel %vm778_vm12, %v1108_v29, %v775_v34 }
 0x68d   : > { %v780_v37 = vmul.f32 %v779_v36, %v763_v21 }
 0x68f   : > { %v784_v39 = vmul.f32 %v1083_v35, %v780_v37 }
 0x691   : > { %v788_v40 = vadd.f32 %v1084_v9, %v784_v39 }
 0x693   : > { %v789_v38 = vpack.c.bf16 %v788_v40, %v788_v40 }
 0x695   : > { %1015 = vmatmul.msk.bf16.vlgmr.msra.gmra.mxu2 %vm387_vm0, %v789_v38 }
 0x718   : > { %v822_v46 = vpop.f32.mrf.mxu2 }
 0x719   : > { %v823_v50 = vadd.f32 %v1085_v45, %v822_v46 }
 0x71b   : > { %v826_v51 = vmul.f32 %v823_v50, %v823_v50 }
 0x71d   : > { %v827_v52 = vmul.f32 %v826_v51, %v823_v50 }
 0x71f   : > { %v828_v53 = vmul.f32 0.044715, %v827_v52 }
 0x720   : > { %v824_v54 = vpop.f32.mrf.mxu2 }
 0x721   : > { %v829_v55 = vadd.f32 %v828_v53, %v823_v50 }
 0x723   : > { %v830_v56 = vmul.f32 0.7978846, %v829_v55 }
 0x725   : > { %1109 = vtanh.f32 %v830_v56 }
 0x72b   : > { %v1110_v57 = vpop.eup %1109 }
 0x72c   : > { %v832_v58 = vadd.f32 1.0, %v1110_v57 }
 0x72e   : > { %v833_v59 = vmul.f32 0.5, %v832_v58 }
 0x730   : > { %v834_v60 = vmul.f32 %v833_v59, %v823_v50 }
 0x732   : > { %v835_v61 = vpack.c.bf16 %v834_v60, %v834_v60 }
 0x734   : > { %912 = vmatmul.bf16.vlgmr.msra.gmra.mxu3 %v835_v61 }
 0x7b7   : > { %v913_v63 = vpop.f32.mrf.mxu3 }
 0x7b8   : > { %v914_v0 = vadd.f32 %v1086_v62, %v913_v63 }
 0x7ba   : > { %v917_v2 = vadd.f32 %v914_v0, %v1280_v16 }
 0x7bc   : > { %v918_v3 = vpack.c.bf16 %v917_v2, %v917_v2 }
 0x7be   : > { %920 = vst.msk [vmem:[%s381_s25] sm:$0xf] %vm919_vm13, %v918_v3 }
 0x7bf   : > { %v915_v4 = vpop.f32.mrf.mxu3 }
 0x7c0 PF: > { %s21_s17 = sadd.s32 1, %s1117_s17  }
 0x7c1   : > { %p18_p4 = scmp.ge.s32.totalorder %s21_s17, 4  }
 0x7c3   :  { %20 = sbr.rel (!%p18_p4) target bundleno = 1 (0x1), region = 94 }

</bundles_post_ra>
